<compile_context>
chip_gen: v5e
topology: v5e:2x2
jax: 0.10.0
libtpu: 0.0.40
codegen_flags: <defaults>
</compile_context>

<pallas_src>
import functools

import jax
import jax.numpy as jnp
from jax import lax
from jax.experimental import pallas as pl
from jax.experimental.pallas import tpu as pltpu


def _elu(x):
    # ELU with alpha = 1.0 (PyTorch default); exp(x)-1 matches the reference.
    return jnp.where(x > 0.0, x, jnp.exp(x) - 1.0)


def canet_kernel(x_ref, wih_ref, whh_ref, blstm_ref,
                 w1_ref, b1_ref, w2_ref, b2_ref, w3_ref, b3_ref,
                 out_ref, xg_ref, *, seq_len, batch):
    T, B = seq_len, batch
    H = whh_ref.shape[0]          # whh_t is (H, 4H)

    whh = whh_ref[...]            # (H, 4H), resident across the unrolled loop

    # ---- hoisted input projection: one lane-dense matmul for all timesteps.
    # x_ref is time-major flattened (T*B, D); result (T*B, 4H) -> VMEM scratch.
    xg_ref[...] = (jnp.dot(x_ref[...], wih_ref[...],
                           preferred_element_type=jnp.float32)
                   + blstm_ref[...])

    # Per-lane scale/offset vregs, computed ONCE before the loop.
    #   sigmoid(x) = 0.5 * tanh(0.5 * x) + 0.5   (i, f, o lanes)
    #   tanh(x)                                   (g lanes)
    # PyTorch gate order along the 4H lane axis: [ i | f | g | o ].
    lane = lax.broadcasted_iota(jnp.int32, (B, 4 * H), 1)
    is_g = jnp.logical_and(lane >= 2 * H, lane < 3 * H)
    scale = jnp.where(is_g, 1.0, 0.5).astype(jnp.float32)   # pre == post scale
    offset = jnp.where(is_g, 0.0, 0.5).astype(jnp.float32)

    def step(t, carry):
        h, c = carry
        row = pl.multiple_of(t * B, B)                       # sublane-aligned
        gates = xg_ref[pl.ds(row, B), :] + jnp.dot(
            h, whh, preferred_element_type=jnp.float32)      # (B, 4H): 1 vreg
        # Single full-vreg tanh serves all four gates; no selects on the chain.
        act = jnp.tanh(gates * scale) * scale + offset
        i_g = act[:, 0 * H:1 * H]
        f_g = act[:, 1 * H:2 * H]
        g_g = act[:, 2 * H:3 * H]
        o_g = act[:, 3 * H:4 * H]
        c_new = f_g * c + i_g * g_g
        h_new = o_g * jnp.tanh(c_new)
        return (h_new, c_new)

    h0 = jnp.zeros((B, H), jnp.float32)
    c0 = jnp.zeros((B, H), jnp.float32)
    # T is static -> fully unroll so adjacent steps can share VLIW bundles.
    h_last, _ = lax.fori_loop(0, T, step, (h0, c0), unroll=True)

    # FC head.  All weights/biases were zero-padded to N=128 in the wrapper so
    # every epilogue matmul and the final store are lane-dense.  Padded lanes
    # stay exactly 0 through ELU (elu(0) == 0) and zero weight rows.
    y = _elu(jnp.dot(h_last, w1_ref[...], preferred_element_type=jnp.float32)
             + b1_ref[...])
    y = _elu(jnp.dot(y, w2_ref[...], preferred_element_type=jnp.float32)
             + b2_ref[...])
    y = _elu(jnp.dot(y, w3_ref[...], preferred_element_type=jnp.float32)
             + b3_ref[...])
    out_ref[...] = y


def canet_forward(x, params, *, npad=128):
    """x: (B, 27, input_size) float32. Returns (B, 6)."""
    B, T, D = x.shape
    H = params["whh"].shape[1]            # weight_hh_l0 is (4H, H)

    # glue: reshapes / transposes / padding of inputs and weights (layout prep)
    x_tm = jnp.transpose(x, (1, 0, 2)).reshape(T * B, D)     # time-major flat
    wih_t = params["wih"].T                                  # (D, 4H)
    whh_t = params["whh"].T                                  # (H, 4H)
    b_lstm = (params["bih"] + params["bhh"]).reshape(1, -1)  # (1, 4H)

    def pad_head(w_t, b, k_pad):
        k, n = w_t.shape
        w_p = jnp.zeros((k_pad, npad), jnp.float32).at[:k, :n].set(w_t)
        b_p = jnp.zeros((1, npad), jnp.float32).at[0, :n].set(b)
        return w_p, b_p

    w1_p, b1_p = pad_head(params["w1"].T, params["b1"], H)      # (32, 128)
    w2_p, b2_p = pad_head(params["w2"].T, params["b2"], npad)   # (128, 128)
    w3_p, b3_p = pad_head(params["w3"].T, params["b3"], npad)   # (128, 128)

    vmem = pl.BlockSpec(memory_space=pltpu.MemorySpace.VMEM)
    kernel = functools.partial(canet_kernel, seq_len=T, batch=B)
    out_pad = pl.pallas_call(
        kernel,
        out_shape=jax.ShapeDtypeStruct((B, npad), jnp.float32),
        in_specs=[vmem] * 10,
        out_specs=vmem,
        scratch_shapes=[pltpu.VMEM((T * B, 4 * H), jnp.float32)],
    )(x_tm, wih_t, whh_t, b_lstm, w1_p, b1_p, w2_p, b2_p, w3_p, b3_p)
    return out_pad[:, :6]


def canet_reference(x, params):
    """Pure-JAX reference matching torch.nn.LSTM + FC_ELU semantics."""
    B, T, D = x.shape
    H = params["whh"].shape[1]
    h = jnp.zeros((B, H), jnp.float32)
    c = jnp.zeros((B, H), jnp.float32)
    bias = params["bih"] + params["bhh"]
    for t in range(T):
        gates = x[:, t, :] @ params["wih"].T + h @ params["whh"].T + bias
        i_g = jax.nn.sigmoid(gates[:, 0 * H:1 * H])
        f_g = jax.nn.sigmoid(gates[:, 1 * H:2 * H])
        g_g = jnp.tanh(gates[:, 2 * H:3 * H])
        o_g = jax.nn.sigmoid(gates[:, 3 * H:4 * H])
        c = f_g * c + i_g * g_g
        h = o_g * jnp.tanh(c)

    def elu(v):
        return jnp.where(v > 0, v, jnp.exp(v) - 1.0)

    y = elu(h @ params["w1"].T + params["b1"])
    y = elu(y @ params["w2"].T + params["b2"])
    y = elu(y @ params["w3"].T + params["b3"])
    return y


def init_params(key, input_size, hidden_size):
    ks = jax.random.split(key, 10)
    H, D = hidden_size, input_size
    s = 0.1
    return {
        # LSTM layer 0 (num_layers = 1), PyTorch parameter shapes
        "wih": s * jax.random.normal(ks[0], (4 * H, D), jnp.float32),
        "whh": s * jax.random.normal(ks[1], (4 * H, H), jnp.float32),
        "bih": s * jax.random.normal(ks[2], (4 * H,), jnp.float32),
        "bhh": s * jax.random.normal(ks[3], (4 * H,), jnp.float32),
        # fc1: 32 -> 16, fc2: 16 -> 4, fc3: 4 -> 6
        "w1": s * jax.random.normal(ks[4], (16, 32), jnp.float32),
        "b1": s * jax.random.normal(ks[5], (16,), jnp.float32),
        "w2": s * jax.random.normal(ks[6], (4, 16), jnp.float32),
        "b2": s * jax.random.normal(ks[7], (4,), jnp.float32),
        "w3": s * jax.random.normal(ks[8], (6, 4), jnp.float32),
        "b3": s * jax.random.normal(ks[9], (6,), jnp.float32),
    }


if __name__ == "__main__":
    # CANet(input_size=8, hidden_size=32, num_layers=1)
    # hidden_size must be 32 because fc1 consumes the 32-dim last hidden state.
    input_size, hidden_size = 8, 32
    B, T = 8, 27

    key = jax.random.PRNGKey(0)
    k_x, k_p = jax.random.split(key)
    # forward() does x.reshape(-1, 27, input_size); build x already in that shape
    x = jax.random.normal(k_x, (B, T, input_size), jnp.float32)
    params = init_params(k_p, input_size, hidden_size)

    out = canet_forward(x, params)
    out = jax.block_until_ready(out)

    ref = canet_reference(x, params)
    assert out.shape == (B, 6)
    assert jnp.allclose(out, ref, atol=1e-4, rtol=1e-4), (
        f"mismatch: max abs err {jnp.max(jnp.abs(out - ref))}")
    print("KERNEL_OK")
</pallas_src>

<mosaic_0001>
module attributes {stable_mosaic.version = 11 : i64} {
  func.func @canet_kernel(%arg0: memref<216x8xf32, #tpu.memory_space<vmem>>, %arg1: memref<8x128xf32, #tpu.memory_space<vmem>>, %arg2: memref<32x128xf32, #tpu.memory_space<vmem>>, %arg3: memref<1x128xf32, #tpu.memory_space<vmem>>, %arg4: memref<32x128xf32, #tpu.memory_space<vmem>>, %arg5: memref<1x128xf32, #tpu.memory_space<vmem>>, %arg6: memref<128x128xf32, #tpu.memory_space<vmem>>, %arg7: memref<1x128xf32, #tpu.memory_space<vmem>>, %arg8: memref<128x128xf32, #tpu.memory_space<vmem>>, %arg9: memref<1x128xf32, #tpu.memory_space<vmem>>, %arg10: memref<8x128xf32, #tpu.memory_space<vmem>>, %arg11: memref<216x128xf32, #tpu.memory_space<vmem>>) attributes {dimension_semantics = [], scalar_prefetch = 0 : i64, scratch_operands = 1 : i64, tpu.core_type = #tpu.core_type<tc>} {
    %c0 = arith.constant 0 : index
    %c0_0 = arith.constant 0 : index
    %0 = vector.load %arg2[%c0, %c0_0] : memref<32x128xf32, #tpu.memory_space<vmem>>, vector<32x128xf32>
    %c0_1 = arith.constant 0 : index
    %c0_2 = arith.constant 0 : index
    %1 = vector.load %arg0[%c0_1, %c0_2] : memref<216x8xf32, #tpu.memory_space<vmem>>, vector<216x8xf32>
    %c0_3 = arith.constant 0 : index
    %c0_4 = arith.constant 0 : index
    %2 = vector.load %arg1[%c0_3, %c0_4] : memref<8x128xf32, #tpu.memory_space<vmem>>, vector<8x128xf32>
    %cst = arith.constant dense<0.000000e+00> : vector<216x128xf32>
    %3 = tpu.matmul %1, %2, %cst {dimension_numbers = #tpu.dot_dimension_numbers<[1], [0], [0], [1], [0, 0, 1, 1], [], []>} : vector<216x8xf32>, vector<8x128xf32>, vector<216x128xf32> -> vector<216x128xf32>
    %c0_5 = arith.constant 0 : index
    %c0_6 = arith.constant 0 : index
    %4 = vector.load %arg3[%c0_5, %c0_6] : memref<1x128xf32, #tpu.memory_space<vmem>>, vector<1x128xf32>
    %5 = vector.broadcast %4 : vector<1x128xf32> to vector<216x128xf32>
    %6 = arith.addf %3, %5 : vector<216x128xf32>
    %c0_7 = arith.constant 0 : index
    %c0_8 = arith.constant 0 : index
    %7 = vector.load %arg11[%c0_7, %c0_8] : memref<216x128xf32, #tpu.memory_space<vmem>>, vector<216x128xf32>
    tpu.vector_store %arg11[%c0_7, %c0_8], %6 {strides = array<i32>} : memref<216x128xf32, #tpu.memory_space<vmem>>, vector<216x128xf32>,
    %8 = tpu.iota {dimensions = array<i32: 1>} : vector<8x128xi32>
    %c64_i32 = arith.constant 64 : i32
    %9 = vector.broadcast %c64_i32 : i32 to vector<8x128xi32>
    %10 = arith.cmpi sge, %8, %9 : vector<8x128xi32>
    %c96_i32 = arith.constant 96 : i32
    %11 = vector.broadcast %c96_i32 : i32 to vector<8x128xi32>
    %12 = arith.cmpi slt, %8, %11 : vector<8x128xi32>
    %13 = arith.andi %10, %12 : vector<8x128xi1>
    %cst_9 = arith.constant 1.000000e+00 : f32
    %cst_10 = arith.constant 5.000000e-01 : f32
    %14 = vector.broadcast %cst_9 : f32 to vector<8x128xf32>
    %15 = vector.broadcast %cst_10 : f32 to vector<8x128xf32>
    %16 = arith.select %13, %14, %15 : vector<8x128xi1>, vector<8x128xf32>
    %cst_11 = arith.constant 0.000000e+00 : f32
    %cst_12 = arith.constant 5.000000e-01 : f32
    %17 = vector.broadcast %cst_11 : f32 to vector<8x128xf32>
    %18 = vector.broadcast %cst_12 : f32 to vector<8x128xf32>
    %19 = arith.select %13, %17, %18 : vector<8x128xi1>, vector<8x128xf32>
    %cst_13 = arith.constant 0.000000e+00 : f32
    %20 = vector.broadcast %cst_13 : f32 to vector<8x32xf32>
    %cst_14 = arith.constant 0.000000e+00 : f32
    %21 = vector.broadcast %cst_14 : f32 to vector<8x32xf32>
    %c0_i32 = arith.constant 0 : i32
    %c8_i32 = arith.constant 8 : i32
    %22 = arith.muli %c0_i32, %c8_i32 : i32
    %23 = tpu.assume_multiple %22, 8 : i32
    %24 = arith.index_cast %23 : i32 to index
    %c0_15 = arith.constant 0 : index
    %25 = vector.load %arg11[%24, %c0_15] : memref<216x128xf32, #tpu.memory_space<vmem>>, vector<8x128xf32>
    %cst_16 = arith.constant dense<0.000000e+00> : vector<8x128xf32>
    %26 = tpu.matmul %20, %0, %cst_16 {dimension_numbers = #tpu.dot_dimension_numbers<[1], [0], [0], [1], [0, 0, 1, 1], [], []>} : vector<8x32xf32>, vector<32x128xf32>, vector<8x128xf32> -> vector<8x128xf32>
    %27 = arith.addf %25, %26 : vector<8x128xf32>
    %28 = arith.mulf %27, %16 : vector<8x128xf32>
    %29 = math.tanh %28 : vector<8x128xf32>
    %30 = arith.mulf %29, %16 : vector<8x128xf32>
    %31 = arith.addf %30, %19 : vector<8x128xf32>
    %32 = vector.extract_strided_slice %31 {offsets = [0, 0], sizes = [8, 32], strides = [1, 1]} : vector<8x128xf32> to vector<8x32xf32>
    %33 = vector.extract_strided_slice %31 {offsets = [0, 32], sizes = [8, 32], strides = [1, 1]} : vector<8x128xf32> to vector<8x32xf32>
    %34 = vector.extract_strided_slice %31 {offsets = [0, 64], sizes = [8, 32], strides = [1, 1]} : vector<8x128xf32> to vector<8x32xf32>
    %35 = vector.extract_strided_slice %31 {offsets = [0, 96], sizes = [8, 32], strides = [1, 1]} : vector<8x128xf32> to vector<8x32xf32>
    %36 = arith.mulf %33, %21 : vector<8x32xf32>
    %37 = arith.mulf %32, %34 : vector<8x32xf32>
    %38 = arith.addf %36, %37 : vector<8x32xf32>
    %39 = math.tanh %38 : vector<8x32xf32>
    %40 = arith.mulf %35, %39 : vector<8x32xf32>
    %c1_i32 = arith.constant 1 : i32
    %c8_i32_17 = arith.constant 8 : i32
    %41 = arith.muli %c1_i32, %c8_i32_17 : i32
    %42 = tpu.assume_multiple %41, 8 : i32
    %43 = arith.index_cast %42 : i32 to index
    %c0_18 = arith.constant 0 : index
    %44 = vector.load %arg11[%43, %c0_18] : memref<216x128xf32, #tpu.memory_space<vmem>>, vector<8x128xf32>
    %cst_19 = arith.constant dense<0.000000e+00> : vector<8x128xf32>
    %45 = tpu.matmul %40, %0, %cst_19 {dimension_numbers = #tpu.dot_dimension_numbers<[1], [0], [0], [1], [0, 0, 1, 1], [], []>} : vector<8x32xf32>, vector<32x128xf32>, vector<8x128xf32> -> vector<8x128xf32>
    %46 = arith.addf %44, %45 : vector<8x128xf32>
    %47 = arith.mulf %46, %16 : vector<8x128xf32>
    %48 = math.tanh %47 : vector<8x128xf32>
    %49 = arith.mulf %48, %16 : vector<8x128xf32>
    %50 = arith.addf %49, %19 : vector<8x128xf32>
    %51 = vector.extract_strided_slice %50 {offsets = [0, 0], sizes = [8, 32], strides = [1, 1]} : vector<8x128xf32> to vector<8x32xf32>
    %52 = vector.extract_strided_slice %50 {offsets = [0, 32], sizes = [8, 32], strides = [1, 1]} : vector<8x128xf32> to vector<8x32xf32>
    %53 = vector.extract_strided_slice %50 {offsets = [0, 64], sizes = [8, 32], strides = [1, 1]} : vector<8x128xf32> to vector<8x32xf32>
    %54 = vector.extract_strided_slice %50 {offsets = [0, 96], sizes = [8, 32], strides = [1, 1]} : vector<8x128xf32> to vector<8x32xf32>
    %55 = arith.mulf %52, %38 : vector<8x32xf32>
    %56 = arith.mulf %51, %53 : vector<8x32xf32>
    %57 = arith.addf %55, %56 : vector<8x32xf32>
    %58 = math.tanh %57 : vector<8x32xf32>
    %59 = arith.mulf %54, %58 : vector<8x32xf32>
    %c2_i32 = arith.constant 2 : i32
    %c8_i32_20 = arith.constant 8 : i32
    %60 = arith.muli %c2_i32, %c8_i32_20 : i32
    %61 = tpu.assume_multiple %60, 8 : i32
    %62 = arith.index_cast %61 : i32 to index
    %c0_21 = arith.constant 0 : index
    %63 = vector.load %arg11[%62, %c0_21] : memref<216x128xf32, #tpu.memory_space<vmem>>, vector<8x128xf32>
    %cst_22 = arith.constant dense<0.000000e+00> : vector<8x128xf32>
    %64 = tpu.matmul %59, %0, %cst_22 {dimension_numbers = #tpu.dot_dimension_numbers<[1], [0], [0], [1], [0, 0, 1, 1], [], []>} : vector<8x32xf32>, vector<32x128xf32>, vector<8x128xf32> -> vector<8x128xf32>
    %65 = arith.addf %63, %64 : vector<8x128xf32>
    %66 = arith.mulf %65, %16 : vector<8x128xf32>
    %67 = math.tanh %66 : vector<8x128xf32>
    %68 = arith.mulf %67, %16 : vector<8x128xf32>
    %69 = arith.addf %68, %19 : vector<8x128xf32>
    %70 = vector.extract_strided_slice %69 {offsets = [0, 0], sizes = [8, 32], strides = [1, 1]} : vector<8x128xf32> to vector<8x32xf32>
    %71 = vector.extract_strided_slice %69 {offsets = [0, 32], sizes = [8, 32], strides = [1, 1]} : vector<8x128xf32> to vector<8x32xf32>
    %72 = vector.extract_strided_slice %69 {offsets = [0, 64], sizes = [8, 32], strides = [1, 1]} : vector<8x128xf32> to vector<8x32xf32>
    %73 = vector.extract_strided_slice %69 {offsets = [0, 96], sizes = [8, 32], strides = [1, 1]} : vector<8x128xf32> to vector<8x32xf32>
    %74 = arith.mulf %71, %57 : vector<8x32xf32>
    %75 = arith.mulf %70, %72 : vector<8x32xf32>
    %76 = arith.addf %74, %75 : vector<8x32xf32>
    %77 = math.tanh %76 : vector<8x32xf32>
    %78 = arith.mulf %73, %77 : vector<8x32xf32>
    %c3_i32 = arith.constant 3 : i32
    %c8_i32_23 = arith.constant 8 : i32
    %79 = arith.muli %c3_i32, %c8_i32_23 : i32
    %80 = tpu.assume_multiple %79, 8 : i32
    %81 = arith.index_cast %80 : i32 to index
    %c0_24 = arith.constant 0 : index
    %82 = vector.load %arg11[%81, %c0_24] : memref<216x128xf32, #tpu.memory_space<vmem>>, vector<8x128xf32>
    %cst_25 = arith.constant dense<0.000000e+00> : vector<8x128xf32>
    %83 = tpu.matmul %78, %0, %cst_25 {dimension_numbers = #tpu.dot_dimension_numbers<[1], [0], [0], [1], [0, 0, 1, 1], [], []>} : vector<8x32xf32>, vector<32x128xf32>, vector<8x128xf32> -> vector<8x128xf32>
    %84 = arith.addf %82, %83 : vector<8x128xf32>
    %85 = arith.mulf %84, %16 : vector<8x128xf32>
    %86 = math.tanh %85 : vector<8x128xf32>
    %87 = arith.mulf %86, %16 : vector<8x128xf32>
    %88 = arith.addf %87, %19 : vector<8x128xf32>
    %89 = vector.extract_strided_slice %88 {offsets = [0, 0], sizes = [8, 32], strides = [1, 1]} : vector<8x128xf32> to vector<8x32xf32>
    %90 = vector.extract_strided_slice %88 {offsets = [0, 32], sizes = [8, 32], strides = [1, 1]} : vector<8x128xf32> to vector<8x32xf32>
    %91 = vector.extract_strided_slice %88 {offsets = [0, 64], sizes = [8, 32], strides = [1, 1]} : vector<8x128xf32> to vector<8x32xf32>
    %92 = vector.extract_strided_slice %88 {offsets = [0, 96], sizes = [8, 32], strides = [1, 1]} : vector<8x128xf32> to vector<8x32xf32>
    %93 = arith.mulf %90, %76 : vector<8x32xf32>
    %94 = arith.mulf %89, %91 : vector<8x32xf32>
    %95 = arith.addf %93, %94 : vector<8x32xf32>
    %96 = math.tanh %95 : vector<8x32xf32>
    %97 = arith.mulf %92, %96 : vector<8x32xf32>
    %c4_i32 = arith.constant 4 : i32
    %c8_i32_26 = arith.constant 8 : i32
    %98 = arith.muli %c4_i32, %c8_i32_26 : i32
    %99 = tpu.assume_multiple %98, 8 : i32
    %100 = arith.index_cast %99 : i32 to index
    %c0_27 = arith.constant 0 : index
    %101 = vector.load %arg11[%100, %c0_27] : memref<216x128xf32, #tpu.memory_space<vmem>>, vector<8x128xf32>
    %cst_28 = arith.constant dense<0.000000e+00> : vector<8x128xf32>
    %102 = tpu.matmul %97, %0, %cst_28 {dimension_numbers = #tpu.dot_dimension_numbers<[1], [0], [0], [1], [0, 0, 1, 1], [], []>} : vector<8x32xf32>, vector<32x128xf32>, vector<8x128xf32> -> vector<8x128xf32>
    %103 = arith.addf %101, %102 : vector<8x128xf32>
    %104 = arith.mulf %103, %16 : vector<8x128xf32>
    %105 = math.tanh %104 : vector<8x128xf32>
    %106 = arith.mulf %105, %16 : vector<8x128xf32>
    %107 = arith.addf %106, %19 : vector<8x128xf32>
    %108 = vector.extract_strided_slice %107 {offsets = [0, 0], sizes = [8, 32], strides = [1, 1]} : vector<8x128xf32> to vector<8x32xf32>
    %109 = vector.extract_strided_slice %107 {offsets = [0, 32], sizes = [8, 32], strides = [1, 1]} : vector<8x128xf32> to vector<8x32xf32>
    %110 = vector.extract_strided_slice %107 {offsets = [0, 64], sizes = [8, 32], strides = [1, 1]} : vector<8x128xf32> to vector<8x32xf32>
    %111 = vector.extract_strided_slice %107 {offsets = [0, 96], sizes = [8, 32], strides = [1, 1]} : vector<8x128xf32> to vector<8x32xf32>
    %112 = arith.mulf %109, %95 : vector<8x32xf32>
    %113 = arith.mulf %108, %110 : vector<8x32xf32>
    %114 = arith.addf %112, %113 : vector<8x32xf32>
    %115 = math.tanh %114 : vector<8x32xf32>
    %116 = arith.mulf %111, %115 : vector<8x32xf32>
    %c5_i32 = arith.constant 5 : i32
    %c8_i32_29 = arith.constant 8 : i32
    %117 = arith.muli %c5_i32, %c8_i32_29 : i32
    %118 = tpu.assume_multiple %117, 8 : i32
    %119 = arith.index_cast %118 : i32 to index
    %c0_30 = arith.constant 0 : index
    %120 = vector.load %arg11[%119, %c0_30] : memref<216x128xf32, #tpu.memory_space<vmem>>, vector<8x128xf32>
    %cst_31 = arith.constant dense<0.000000e+00> : vector<8x128xf32>
    %121 = tpu.matmul %116, %0, %cst_31 {dimension_numbers = #tpu.dot_dimension_numbers<[1], [0], [0], [1], [0, 0, 1, 1], [], []>} : vector<8x32xf32>, vector<32x128xf32>, vector<8x128xf32> -> vector<8x128xf32>
    %122 = arith.addf %120, %121 : vector<8x128xf32>
    %123 = arith.mulf %122, %16 : vector<8x128xf32>
    %124 = math.tanh %123 : vector<8x128xf32>
    %125 = arith.mulf %124, %16 : vector<8x128xf32>
    %126 = arith.addf %125, %19 : vector<8x128xf32>
    %127 = vector.extract_strided_slice %126 {offsets = [0, 0], sizes = [8, 32], strides = [1, 1]} : vector<8x128xf32> to vector<8x32xf32>
    %128 = vector.extract_strided_slice %126 {offsets = [0, 32], sizes = [8, 32], strides = [1, 1]} : vector<8x128xf32> to vector<8x32xf32>
    %129 = vector.extract_strided_slice %126 {offsets = [0, 64], sizes = [8, 32], strides = [1, 1]} : vector<8x128xf32> to vector<8x32xf32>
    %130 = vector.extract_strided_slice %126 {offsets = [0, 96], sizes = [8, 32], strides = [1, 1]} : vector<8x128xf32> to vector<8x32xf32>
    %131 = arith.mulf %128, %114 : vector<8x32xf32>
    %132 = arith.mulf %127, %129 : vector<8x32xf32>
    %133 = arith.addf %131, %132 : vector<8x32xf32>
    %134 = math.tanh %133 : vector<8x32xf32>
    %135 = arith.mulf %130, %134 : vector<8x32xf32>
    %c6_i32 = arith.constant 6 : i32
    %c8_i32_32 = arith.constant 8 : i32
    %136 = arith.muli %c6_i32, %c8_i32_32 : i32
    %137 = tpu.assume_multiple %136, 8 : i32
    %138 = arith.index_cast %137 : i32 to index
    %c0_33 = arith.constant 0 : index
    %139 = vector.load %arg11[%138, %c0_33] : memref<216x128xf32, #tpu.memory_space<vmem>>, vector<8x128xf32>
    %cst_34 = arith.constant dense<0.000000e+00> : vector<8x128xf32>
    %140 = tpu.matmul %135, %0, %cst_34 {dimension_numbers = #tpu.dot_dimension_numbers<[1], [0], [0], [1], [0, 0, 1, 1], [], []>} : vector<8x32xf32>, vector<32x128xf32>, vector<8x128xf32> -> vector<8x128xf32>
    %141 = arith.addf %139, %140 : vector<8x128xf32>
    %142 = arith.mulf %141, %16 : vector<8x128xf32>
    %143 = math.tanh %142 : vector<8x128xf32>
    %144 = arith.mulf %143, %16 : vector<8x128xf32>
    %145 = arith.addf %144, %19 : vector<8x128xf32>
    %146 = vector.extract_strided_slice %145 {offsets = [0, 0], sizes = [8, 32], strides = [1, 1]} : vector<8x128xf32> to vector<8x32xf32>
    %147 = vector.extract_strided_slice %145 {offsets = [0, 32], sizes = [8, 32], strides = [1, 1]} : vector<8x128xf32> to vector<8x32xf32>
    %148 = vector.extract_strided_slice %145 {offsets = [0, 64], sizes = [8, 32], strides = [1, 1]} : vector<8x128xf32> to vector<8x32xf32>
    %149 = vector.extract_strided_slice %145 {offsets = [0, 96], sizes = [8, 32], strides = [1, 1]} : vector<8x128xf32> to vector<8x32xf32>
    %150 = arith.mulf %147, %133 : vector<8x32xf32>
    %151 = arith.mulf %146, %148 : vector<8x32xf32>
    %152 = arith.addf %150, %151 : vector<8x32xf32>
    %153 = math.tanh %152 : vector<8x32xf32>
    %154 = arith.mulf %149, %153 : vector<8x32xf32>
    %c7_i32 = arith.constant 7 : i32
    %c8_i32_35 = arith.constant 8 : i32
    %155 = arith.muli %c7_i32, %c8_i32_35 : i32
    %156 = tpu.assume_multiple %155, 8 : i32
    %157 = arith.index_cast %156 : i32 to index
    %c0_36 = arith.constant 0 : index
    %158 = vector.load %arg11[%157, %c0_36] : memref<216x128xf32, #tpu.memory_space<vmem>>, vector<8x128xf32>
    %cst_37 = arith.constant dense<0.000000e+00> : vector<8x128xf32>
    %159 = tpu.matmul %154, %0, %cst_37 {dimension_numbers = #tpu.dot_dimension_numbers<[1], [0], [0], [1], [0, 0, 1, 1], [], []>} : vector<8x32xf32>, vector<32x128xf32>, vector<8x128xf32> -> vector<8x128xf32>
    %160 = arith.addf %158, %159 : vector<8x128xf32>
    %161 = arith.mulf %160, %16 : vector<8x128xf32>
    %162 = math.tanh %161 : vector<8x128xf32>
    %163 = arith.mulf %162, %16 : vector<8x128xf32>
    %164 = arith.addf %163, %19 : vector<8x128xf32>
    %165 = vector.extract_strided_slice %164 {offsets = [0, 0], sizes = [8, 32], strides = [1, 1]} : vector<8x128xf32> to vector<8x32xf32>
    %166 = vector.extract_strided_slice %164 {offsets = [0, 32], sizes = [8, 32], strides = [1, 1]} : vector<8x128xf32> to vector<8x32xf32>
    %167 = vector.extract_strided_slice %164 {offsets = [0, 64], sizes = [8, 32], strides = [1, 1]} : vector<8x128xf32> to vector<8x32xf32>
    %168 = vector.extract_strided_slice %164 {offsets = [0, 96], sizes = [8, 32], strides = [1, 1]} : vector<8x128xf32> to vector<8x32xf32>
    %169 = arith.mulf %166, %152 : vector<8x32xf32>
    %170 = arith.mulf %165, %167 : vector<8x32xf32>
    %171 = arith.addf %169, %170 : vector<8x32xf32>
    %172 = math.tanh %171 : vector<8x32xf32>
    %173 = arith.mulf %168, %172 : vector<8x32xf32>
    %c8_i32_38 = arith.constant 8 : i32
    %c8_i32_39 = arith.constant 8 : i32
    %174 = arith.muli %c8_i32_38, %c8_i32_39 : i32
    %175 = tpu.assume_multiple %174, 8 : i32
    %176 = arith.index_cast %175 : i32 to index
    %c0_40 = arith.constant 0 : index
    %177 = vector.load %arg11[%176, %c0_40] : memref<216x128xf32, #tpu.memory_space<vmem>>, vector<8x128xf32>
    %cst_41 = arith.constant dense<0.000000e+00> : vector<8x128xf32>
    %178 = tpu.matmul %173, %0, %cst_41 {dimension_numbers = #tpu.dot_dimension_numbers<[1], [0], [0], [1], [0, 0, 1, 1], [], []>} : vector<8x32xf32>, vector<32x128xf32>, vector<8x128xf32> -> vector<8x128xf32>
    %179 = arith.addf %177, %178 : vector<8x128xf32>
    %180 = arith.mulf %179, %16 : vector<8x128xf32>
    %181 = math.tanh %180 : vector<8x128xf32>
    %182 = arith.mulf %181, %16 : vector<8x128xf32>
    %183 = arith.addf %182, %19 : vector<8x128xf32>
    %184 = vector.extract_strided_slice %183 {offsets = [0, 0], sizes = [8, 32], strides = [1, 1]} : vector<8x128xf32> to vector<8x32xf32>
    %185 = vector.extract_strided_slice %183 {offsets = [0, 32], sizes = [8, 32], strides = [1, 1]} : vector<8x128xf32> to vector<8x32xf32>
    %186 = vector.extract_strided_slice %183 {offsets = [0, 64], sizes = [8, 32], strides = [1, 1]} : vector<8x128xf32> to vector<8x32xf32>
    %187 = vector.extract_strided_slice %183 {offsets = [0, 96], sizes = [8, 32], strides = [1, 1]} : vector<8x128xf32> to vector<8x32xf32>
    %188 = arith.mulf %185, %171 : vector<8x32xf32>
    %189 = arith.mulf %184, %186 : vector<8x32xf32>
    %190 = arith.addf %188, %189 : vector<8x32xf32>
    %191 = math.tanh %190 : vector<8x32xf32>
    %192 = arith.mulf %187, %191 : vector<8x32xf32>
    %c9_i32 = arith.constant 9 : i32
    %c8_i32_42 = arith.constant 8 : i32
    %193 = arith.muli %c9_i32, %c8_i32_42 : i32
    %194 = tpu.assume_multiple %193, 8 : i32
    %195 = arith.index_cast %194 : i32 to index
    %c0_43 = arith.constant 0 : index
    %196 = vector.load %arg11[%195, %c0_43] : memref<216x128xf32, #tpu.memory_space<vmem>>, vector<8x128xf32>
    %cst_44 = arith.constant dense<0.000000e+00> : vector<8x128xf32>
    %197 = tpu.matmul %192, %0, %cst_44 {dimension_numbers = #tpu.dot_dimension_numbers<[1], [0], [0], [1], [0, 0, 1, 1], [], []>} : vector<8x32xf32>, vector<32x128xf32>, vector<8x128xf32> -> vector<8x128xf32>
    %198 = arith.addf %196, %197 : vector<8x128xf32>
    %199 = arith.mulf %198, %16 : vector<8x128xf32>
    %200 = math.tanh %199 : vector<8x128xf32>
    %201 = arith.mulf %200, %16 : vector<8x128xf32>
    %202 = arith.addf %201, %19 : vector<8x128xf32>
    %203 = vector.extract_strided_slice %202 {offsets = [0, 0], sizes = [8, 32], strides = [1, 1]} : vector<8x128xf32> to vector<8x32xf32>
    %204 = vector.extract_strided_slice %202 {offsets = [0, 32], sizes = [8, 32], strides = [1, 1]} : vector<8x128xf32> to vector<8x32xf32>
    %205 = vector.extract_strided_slice %202 {offsets = [0, 64], sizes = [8, 32], strides = [1, 1]} : vector<8x128xf32> to vector<8x32xf32>
    %206 = vector.extract_strided_slice %202 {offsets = [0, 96], sizes = [8, 32], strides = [1, 1]} : vector<8x128xf32> to vector<8x32xf32>
    %207 = arith.mulf %204, %190 : vector<8x32xf32>
    %208 = arith.mulf %203, %205 : vector<8x32xf32>
    %209 = arith.addf %207, %208 : vector<8x32xf32>
    %210 = math.tanh %209 : vector<8x32xf32>
    %211 = arith.mulf %206, %210 : vector<8x32xf32>
    %c10_i32 = arith.constant 10 : i32
    %c8_i32_45 = arith.constant 8 : i32
    %212 = arith.muli %c10_i32, %c8_i32_45 : i32
    %213 = tpu.assume_multiple %212, 8 : i32
    %214 = arith.index_cast %213 : i32 to index
    %c0_46 = arith.constant 0 : index
    %215 = vector.load %arg11[%214, %c0_46] : memref<216x128xf32, #tpu.memory_space<vmem>>, vector<8x128xf32>
    %cst_47 = arith.constant dense<0.000000e+00> : vector<8x128xf32>
    %216 = tpu.matmul %211, %0, %cst_47 {dimension_numbers = #tpu.dot_dimension_numbers<[1], [0], [0], [1], [0, 0, 1, 1], [], []>} : vector<8x32xf32>, vector<32x128xf32>, vector<8x128xf32> -> vector<8x128xf32>
    %217 = arith.addf %215, %216 : vector<8x128xf32>
    %218 = arith.mulf %217, %16 : vector<8x128xf32>
    %219 = math.tanh %218 : vector<8x128xf32>
    %220 = arith.mulf %219, %16 : vector<8x128xf32>
    %221 = arith.addf %220, %19 : vector<8x128xf32>
    %222 = vector.extract_strided_slice %221 {offsets = [0, 0], sizes = [8, 32], strides = [1, 1]} : vector<8x128xf32> to vector<8x32xf32>
    %223 = vector.extract_strided_slice %221 {offsets = [0, 32], sizes = [8, 32], strides = [1, 1]} : vector<8x128xf32> to vector<8x32xf32>
    %224 = vector.extract_strided_slice %221 {offsets = [0, 64], sizes = [8, 32], strides = [1, 1]} : vector<8x128xf32> to vector<8x32xf32>
    %225 = vector.extract_strided_slice %221 {offsets = [0, 96], sizes = [8, 32], strides = [1, 1]} : vector<8x128xf32> to vector<8x32xf32>
    %226 = arith.mulf %223, %209 : vector<8x32xf32>
    %227 = arith.mulf %222, %224 : vector<8x32xf32>
    %228 = arith.addf %226, %227 : vector<8x32xf32>
    %229 = math.tanh %228 : vector<8x32xf32>
    %230 = arith.mulf %225, %229 : vector<8x32xf32>
    %c11_i32 = arith.constant 11 : i32
    %c8_i32_48 = arith.constant 8 : i32
    %231 = arith.muli %c11_i32, %c8_i32_48 : i32
    %232 = tpu.assume_multiple %231, 8 : i32
    %233 = arith.index_cast %232 : i32 to index
    %c0_49 = arith.constant 0 : index
    %234 = vector.load %arg11[%233, %c0_49] : memref<216x128xf32, #tpu.memory_space<vmem>>, vector<8x128xf32>
    %cst_50 = arith.constant dense<0.000000e+00> : vector<8x128xf32>
    %235 = tpu.matmul %230, %0, %cst_50 {dimension_numbers = #tpu.dot_dimension_numbers<[1], [0], [0], [1], [0, 0, 1, 1], [], []>} : vector<8x32xf32>, vector<32x128xf32>, vector<8x128xf32> -> vector<8x128xf32>
    %236 = arith.addf %234, %235 : vector<8x128xf32>
    %237 = arith.mulf %236, %16 : vector<8x128xf32>
    %238 = math.tanh %237 : vector<8x128xf32>
    %239 = arith.mulf %238, %16 : vector<8x128xf32>
    %240 = arith.addf %239, %19 : vector<8x128xf32>
    %241 = vector.extract_strided_slice %240 {offsets = [0, 0], sizes = [8, 32], strides = [1, 1]} : vector<8x128xf32> to vector<8x32xf32>
    %242 = vector.extract_strided_slice %240 {offsets = [0, 32], sizes = [8, 32], strides = [1, 1]} : vector<8x128xf32> to vector<8x32xf32>
    %243 = vector.extract_strided_slice %240 {offsets = [0, 64], sizes = [8, 32], strides = [1, 1]} : vector<8x128xf32> to vector<8x32xf32>
    %244 = vector.extract_strided_slice %240 {offsets = [0, 96], sizes = [8, 32], strides = [1, 1]} : vector<8x128xf32> to vector<8x32xf32>
    %245 = arith.mulf %242, %228 : vector<8x32xf32>
    %246 = arith.mulf %241, %243 : vector<8x32xf32>
    %247 = arith.addf %245, %246 : vector<8x32xf32>
    %248 = math.tanh %247 : vector<8x32xf32>
    %249 = arith.mulf %244, %248 : vector<8x32xf32>
    %c12_i32 = arith.constant 12 : i32
    %c8_i32_51 = arith.constant 8 : i32
    %250 = arith.muli %c12_i32, %c8_i32_51 : i32
    %251 = tpu.assume_multiple %250, 8 : i32
    %252 = arith.index_cast %251 : i32 to index
    %c0_52 = arith.constant 0 : index
    %253 = vector.load %arg11[%252, %c0_52] : memref<216x128xf32, #tpu.memory_space<vmem>>, vector<8x128xf32>
    %cst_53 = arith.constant dense<0.000000e+00> : vector<8x128xf32>
    %254 = tpu.matmul %249, %0, %cst_53 {dimension_numbers = #tpu.dot_dimension_numbers<[1], [0], [0], [1], [0, 0, 1, 1], [], []>} : vector<8x32xf32>, vector<32x128xf32>, vector<8x128xf32> -> vector<8x128xf32>
    %255 = arith.addf %253, %254 : vector<8x128xf32>
    %256 = arith.mulf %255, %16 : vector<8x128xf32>
    %257 = math.tanh %256 : vector<8x128xf32>
    %258 = arith.mulf %257, %16 : vector<8x128xf32>
    %259 = arith.addf %258, %19 : vector<8x128xf32>
    %260 = vector.extract_strided_slice %259 {offsets = [0, 0], sizes = [8, 32], strides = [1, 1]} : vector<8x128xf32> to vector<8x32xf32>
    %261 = vector.extract_strided_slice %259 {offsets = [0, 32], sizes = [8, 32], strides = [1, 1]} : vector<8x128xf32> to vector<8x32xf32>
    %262 = vector.extract_strided_slice %259 {offsets = [0, 64], sizes = [8, 32], strides = [1, 1]} : vector<8x128xf32> to vector<8x32xf32>
    %263 = vector.extract_strided_slice %259 {offsets = [0, 96], sizes = [8, 32], strides = [1, 1]} : vector<8x128xf32> to vector<8x32xf32>
    %264 = arith.mulf %261, %247 : vector<8x32xf32>
    %265 = arith.mulf %260, %262 : vector<8x32xf32>
    %266 = arith.addf %264, %265 : vector<8x32xf32>
    %267 = math.tanh %266 : vector<8x32xf32>
    %268 = arith.mulf %263, %267 : vector<8x32xf32>
    %c13_i32 = arith.constant 13 : i32
    %c8_i32_54 = arith.constant 8 : i32
    %269 = arith.muli %c13_i32, %c8_i32_54 : i32
    %270 = tpu.assume_multiple %269, 8 : i32
    %271 = arith.index_cast %270 : i32 to index
    %c0_55 = arith.constant 0 : index
    %272 = vector.load %arg11[%271, %c0_55] : memref<216x128xf32, #tpu.memory_space<vmem>>, vector<8x128xf32>
    %cst_56 = arith.constant dense<0.000000e+00> : vector<8x128xf32>
    %273 = tpu.matmul %268, %0, %cst_56 {dimension_numbers = #tpu.dot_dimension_numbers<[1], [0], [0], [1], [0, 0, 1, 1], [], []>} : vector<8x32xf32>, vector<32x128xf32>, vector<8x128xf32> -> vector<8x128xf32>
    %274 = arith.addf %272, %273 : vector<8x128xf32>
    %275 = arith.mulf %274, %16 : vector<8x128xf32>
    %276 = math.tanh %275 : vector<8x128xf32>
    %277 = arith.mulf %276, %16 : vector<8x128xf32>
    %278 = arith.addf %277, %19 : vector<8x128xf32>
    %279 = vector.extract_strided_slice %278 {offsets = [0, 0], sizes = [8, 32], strides = [1, 1]} : vector<8x128xf32> to vector<8x32xf32>
    %280 = vector.extract_strided_slice %278 {offsets = [0, 32], sizes = [8, 32], strides = [1, 1]} : vector<8x128xf32> to vector<8x32xf32>
    %281 = vector.extract_strided_slice %278 {offsets = [0, 64], sizes = [8, 32], strides = [1, 1]} : vector<8x128xf32> to vector<8x32xf32>
    %282 = vector.extract_strided_slice %278 {offsets = [0, 96], sizes = [8, 32], strides = [1, 1]} : vector<8x128xf32> to vector<8x32xf32>
    %283 = arith.mulf %280, %266 : vector<8x32xf32>
    %284 = arith.mulf %279, %281 : vector<8x32xf32>
    %285 = arith.addf %283, %284 : vector<8x32xf32>
    %286 = math.tanh %285 : vector<8x32xf32>
    %287 = arith.mulf %282, %286 : vector<8x32xf32>
    %c14_i32 = arith.constant 14 : i32
    %c8_i32_57 = arith.constant 8 : i32
    %288 = arith.muli %c14_i32, %c8_i32_57 : i32
    %289 = tpu.assume_multiple %288, 8 : i32
    %290 = arith.index_cast %289 : i32 to index
    %c0_58 = arith.constant 0 : index
    %291 = vector.load %arg11[%290, %c0_58] : memref<216x128xf32, #tpu.memory_space<vmem>>, vector<8x128xf32>
    %cst_59 = arith.constant dense<0.000000e+00> : vector<8x128xf32>
    %292 = tpu.matmul %287, %0, %cst_59 {dimension_numbers = #tpu.dot_dimension_numbers<[1], [0], [0], [1], [0, 0, 1, 1], [], []>} : vector<8x32xf32>, vector<32x128xf32>, vector<8x128xf32> -> vector<8x128xf32>
    %293 = arith.addf %291, %292 : vector<8x128xf32>
    %294 = arith.mulf %293, %16 : vector<8x128xf32>
    %295 = math.tanh %294 : vector<8x128xf32>
    %296 = arith.mulf %295, %16 : vector<8x128xf32>
    %297 = arith.addf %296, %19 : vector<8x128xf32>
    %298 = vector.extract_strided_slice %297 {offsets = [0, 0], sizes = [8, 32], strides = [1, 1]} : vector<8x128xf32> to vector<8x32xf32>
    %299 = vector.extract_strided_slice %297 {offsets = [0, 32], sizes = [8, 32], strides = [1, 1]} : vector<8x128xf32> to vector<8x32xf32>
    %300 = vector.extract_strided_slice %297 {offsets = [0, 64], sizes = [8, 32], strides = [1, 1]} : vector<8x128xf32> to vector<8x32xf32>
    %301 = vector.extract_strided_slice %297 {offsets = [0, 96], sizes = [8, 32], strides = [1, 1]} : vector<8x128xf32> to vector<8x32xf32>
    %302 = arith.mulf %299, %285 : vector<8x32xf32>
    %303 = arith.mulf %298, %300 : vector<8x32xf32>
    %304 = arith.addf %302, %303 : vector<8x32xf32>
    %305 = math.tanh %304 : vector<8x32xf32>
    %306 = arith.mulf %301, %305 : vector<8x32xf32>
    %c15_i32 = arith.constant 15 : i32
    %c8_i32_60 = arith.constant 8 : i32
    %307 = arith.muli %c15_i32, %c8_i32_60 : i32
    %308 = tpu.assume_multiple %307, 8 : i32
    %309 = arith.index_cast %308 : i32 to index
    %c0_61 = arith.constant 0 : index
    %310 = vector.load %arg11[%309, %c0_61] : memref<216x128xf32, #tpu.memory_space<vmem>>, vector<8x128xf32>
    %cst_62 = arith.constant dense<0.000000e+00> : vector<8x128xf32>
    %311 = tpu.matmul %306, %0, %cst_62 {dimension_numbers = #tpu.dot_dimension_numbers<[1], [0], [0], [1], [0, 0, 1, 1], [], []>} : vector<8x32xf32>, vector<32x128xf32>, vector<8x128xf32> -> vector<8x128xf32>
    %312 = arith.addf %310, %311 : vector<8x128xf32>
    %313 = arith.mulf %312, %16 : vector<8x128xf32>
    %314 = math.tanh %313 : vector<8x128xf32>
    %315 = arith.mulf %314, %16 : vector<8x128xf32>
    %316 = arith.addf %315, %19 : vector<8x128xf32>
    %317 = vector.extract_strided_slice %316 {offsets = [0, 0], sizes = [8, 32], strides = [1, 1]} : vector<8x128xf32> to vector<8x32xf32>
    %318 = vector.extract_strided_slice %316 {offsets = [0, 32], sizes = [8, 32], strides = [1, 1]} : vector<8x128xf32> to vector<8x32xf32>
    %319 = vector.extract_strided_slice %316 {offsets = [0, 64], sizes = [8, 32], strides = [1, 1]} : vector<8x128xf32> to vector<8x32xf32>
    %320 = vector.extract_strided_slice %316 {offsets = [0, 96], sizes = [8, 32], strides = [1, 1]} : vector<8x128xf32> to vector<8x32xf32>
    %321 = arith.mulf %318, %304 : vector<8x32xf32>
    %322 = arith.mulf %317, %319 : vector<8x32xf32>
    %323 = arith.addf %321, %322 : vector<8x32xf32>
    %324 = math.tanh %323 : vector<8x32xf32>
    %325 = arith.mulf %320, %324 : vector<8x32xf32>
    %c16_i32 = arith.constant 16 : i32
    %c8_i32_63 = arith.constant 8 : i32
    %326 = arith.muli %c16_i32, %c8_i32_63 : i32
    %327 = tpu.assume_multiple %326, 8 : i32
    %328 = arith.index_cast %327 : i32 to index
    %c0_64 = arith.constant 0 : index
    %329 = vector.load %arg11[%328, %c0_64] : memref<216x128xf32, #tpu.memory_space<vmem>>, vector<8x128xf32>
    %cst_65 = arith.constant dense<0.000000e+00> : vector<8x128xf32>
    %330 = tpu.matmul %325, %0, %cst_65 {dimension_numbers = #tpu.dot_dimension_numbers<[1], [0], [0], [1], [0, 0, 1, 1], [], []>} : vector<8x32xf32>, vector<32x128xf32>, vector<8x128xf32> -> vector<8x128xf32>
    %331 = arith.addf %329, %330 : vector<8x128xf32>
    %332 = arith.mulf %331, %16 : vector<8x128xf32>
    %333 = math.tanh %332 : vector<8x128xf32>
    %334 = arith.mulf %333, %16 : vector<8x128xf32>
    %335 = arith.addf %334, %19 : vector<8x128xf32>
    %336 = vector.extract_strided_slice %335 {offsets = [0, 0], sizes = [8, 32], strides = [1, 1]} : vector<8x128xf32> to vector<8x32xf32>
    %337 = vector.extract_strided_slice %335 {offsets = [0, 32], sizes = [8, 32], strides = [1, 1]} : vector<8x128xf32> to vector<8x32xf32>
    %338 = vector.extract_strided_slice %335 {offsets = [0, 64], sizes = [8, 32], strides = [1, 1]} : vector<8x128xf32> to vector<8x32xf32>
    %339 = vector.extract_strided_slice %335 {offsets = [0, 96], sizes = [8, 32], strides = [1, 1]} : vector<8x128xf32> to vector<8x32xf32>
    %340 = arith.mulf %337, %323 : vector<8x32xf32>
    %341 = arith.mulf %336, %338 : vector<8x32xf32>
    %342 = arith.addf %340, %341 : vector<8x32xf32>
    %343 = math.tanh %342 : vector<8x32xf32>
    %344 = arith.mulf %339, %343 : vector<8x32xf32>
    %c17_i32 = arith.constant 17 : i32
    %c8_i32_66 = arith.constant 8 : i32
    %345 = arith.muli %c17_i32, %c8_i32_66 : i32
    %346 = tpu.assume_multiple %345, 8 : i32
    %347 = arith.index_cast %346 : i32 to index
    %c0_67 = arith.constant 0 : index
    %348 = vector.load %arg11[%347, %c0_67] : memref<216x128xf32, #tpu.memory_space<vmem>>, vector<8x128xf32>
    %cst_68 = arith.constant dense<0.000000e+00> : vector<8x128xf32>
    %349 = tpu.matmul %344, %0, %cst_68 {dimension_numbers = #tpu.dot_dimension_numbers<[1], [0], [0], [1], [0, 0, 1, 1], [], []>} : vector<8x32xf32>, vector<32x128xf32>, vector<8x128xf32> -> vector<8x128xf32>
    %350 = arith.addf %348, %349 : vector<8x128xf32>
    %351 = arith.mulf %350, %16 : vector<8x128xf32>
    %352 = math.tanh %351 : vector<8x128xf32>
    %353 = arith.mulf %352, %16 : vector<8x128xf32>
    %354 = arith.addf %353, %19 : vector<8x128xf32>
    %355 = vector.extract_strided_slice %354 {offsets = [0, 0], sizes = [8, 32], strides = [1, 1]} : vector<8x128xf32> to vector<8x32xf32>
    %356 = vector.extract_strided_slice %354 {offsets = [0, 32], sizes = [8, 32], strides = [1, 1]} : vector<8x128xf32> to vector<8x32xf32>
    %357 = vector.extract_strided_slice %354 {offsets = [0, 64], sizes = [8, 32], strides = [1, 1]} : vector<8x128xf32> to vector<8x32xf32>
    %358 = vector.extract_strided_slice %354 {offsets = [0, 96], sizes = [8, 32], strides = [1, 1]} : vector<8x128xf32> to vector<8x32xf32>
    %359 = arith.mulf %356, %342 : vector<8x32xf32>
    %360 = arith.mulf %355, %357 : vector<8x32xf32>
    %361 = arith.addf %359, %360 : vector<8x32xf32>
    %362 = math.tanh %361 : vector<8x32xf32>
    %363 = arith.mulf %358, %362 : vector<8x32xf32>
    %c18_i32 = arith.constant 18 : i32
    %c8_i32_69 = arith.constant 8 : i32
    %364 = arith.muli %c18_i32, %c8_i32_69 : i32
    %365 = tpu.assume_multiple %364, 8 : i32
    %366 = arith.index_cast %365 : i32 to index
    %c0_70 = arith.constant 0 : index
    %367 = vector.load %arg11[%366, %c0_70] : memref<216x128xf32, #tpu.memory_space<vmem>>, vector<8x128xf32>
    %cst_71 = arith.constant dense<0.000000e+00> : vector<8x128xf32>
    %368 = tpu.matmul %363, %0, %cst_71 {dimension_numbers = #tpu.dot_dimension_numbers<[1], [0], [0], [1], [0, 0, 1, 1], [], []>} : vector<8x32xf32>, vector<32x128xf32>, vector<8x128xf32> -> vector<8x128xf32>
    %369 = arith.addf %367, %368 : vector<8x128xf32>
    %370 = arith.mulf %369, %16 : vector<8x128xf32>
    %371 = math.tanh %370 : vector<8x128xf32>
    %372 = arith.mulf %371, %16 : vector<8x128xf32>
    %373 = arith.addf %372, %19 : vector<8x128xf32>
    %374 = vector.extract_strided_slice %373 {offsets = [0, 0], sizes = [8, 32], strides = [1, 1]} : vector<8x128xf32> to vector<8x32xf32>
    %375 = vector.extract_strided_slice %373 {offsets = [0, 32], sizes = [8, 32], strides = [1, 1]} : vector<8x128xf32> to vector<8x32xf32>
    %376 = vector.extract_strided_slice %373 {offsets = [0, 64], sizes = [8, 32], strides = [1, 1]} : vector<8x128xf32> to vector<8x32xf32>
    %377 = vector.extract_strided_slice %373 {offsets = [0, 96], sizes = [8, 32], strides = [1, 1]} : vector<8x128xf32> to vector<8x32xf32>
    %378 = arith.mulf %375, %361 : vector<8x32xf32>
    %379 = arith.mulf %374, %376 : vector<8x32xf32>
    %380 = arith.addf %378, %379 : vector<8x32xf32>
    %381 = math.tanh %380 : vector<8x32xf32>
    %382 = arith.mulf %377, %381 : vector<8x32xf32>
    %c19_i32 = arith.constant 19 : i32
    %c8_i32_72 = arith.constant 8 : i32
    %383 = arith.muli %c19_i32, %c8_i32_72 : i32
    %384 = tpu.assume_multiple %383, 8 : i32
    %385 = arith.index_cast %384 : i32 to index
    %c0_73 = arith.constant 0 : index
    %386 = vector.load %arg11[%385, %c0_73] : memref<216x128xf32, #tpu.memory_space<vmem>>, vector<8x128xf32>
    %cst_74 = arith.constant dense<0.000000e+00> : vector<8x128xf32>
    %387 = tpu.matmul %382, %0, %cst_74 {dimension_numbers = #tpu.dot_dimension_numbers<[1], [0], [0], [1], [0, 0, 1, 1], [], []>} : vector<8x32xf32>, vector<32x128xf32>, vector<8x128xf32> -> vector<8x128xf32>
    %388 = arith.addf %386, %387 : vector<8x128xf32>
    %389 = arith.mulf %388, %16 : vector<8x128xf32>
    %390 = math.tanh %389 : vector<8x128xf32>
    %391 = arith.mulf %390, %16 : vector<8x128xf32>
    %392 = arith.addf %391, %19 : vector<8x128xf32>
    %393 = vector.extract_strided_slice %392 {offsets = [0, 0], sizes = [8, 32], strides = [1, 1]} : vector<8x128xf32> to vector<8x32xf32>
    %394 = vector.extract_strided_slice %392 {offsets = [0, 32], sizes = [8, 32], strides = [1, 1]} : vector<8x128xf32> to vector<8x32xf32>
    %395 = vector.extract_strided_slice %392 {offsets = [0, 64], sizes = [8, 32], strides = [1, 1]} : vector<8x128xf32> to vector<8x32xf32>
    %396 = vector.extract_strided_slice %392 {offsets = [0, 96], sizes = [8, 32], strides = [1, 1]} : vector<8x128xf32> to vector<8x32xf32>
    %397 = arith.mulf %394, %380 : vector<8x32xf32>
    %398 = arith.mulf %393, %395 : vector<8x32xf32>
    %399 = arith.addf %397, %398 : vector<8x32xf32>
    %400 = math.tanh %399 : vector<8x32xf32>
    %401 = arith.mulf %396, %400 : vector<8x32xf32>
    %c20_i32 = arith.constant 20 : i32
    %c8_i32_75 = arith.constant 8 : i32
    %402 = arith.muli %c20_i32, %c8_i32_75 : i32
    %403 = tpu.assume_multiple %402, 8 : i32
    %404 = arith.index_cast %403 : i32 to index
    %c0_76 = arith.constant 0 : index
    %405 = vector.load %arg11[%404, %c0_76] : memref<216x128xf32, #tpu.memory_space<vmem>>, vector<8x128xf32>
    %cst_77 = arith.constant dense<0.000000e+00> : vector<8x128xf32>
    %406 = tpu.matmul %401, %0, %cst_77 {dimension_numbers = #tpu.dot_dimension_numbers<[1], [0], [0], [1], [0, 0, 1, 1], [], []>} : vector<8x32xf32>, vector<32x128xf32>, vector<8x128xf32> -> vector<8x128xf32>
    %407 = arith.addf %405, %406 : vector<8x128xf32>
    %408 = arith.mulf %407, %16 : vector<8x128xf32>
    %409 = math.tanh %408 : vector<8x128xf32>
    %410 = arith.mulf %409, %16 : vector<8x128xf32>
    %411 = arith.addf %410, %19 : vector<8x128xf32>
    %412 = vector.extract_strided_slice %411 {offsets = [0, 0], sizes = [8, 32], strides = [1, 1]} : vector<8x128xf32> to vector<8x32xf32>
    %413 = vector.extract_strided_slice %411 {offsets = [0, 32], sizes = [8, 32], strides = [1, 1]} : vector<8x128xf32> to vector<8x32xf32>
    %414 = vector.extract_strided_slice %411 {offsets = [0, 64], sizes = [8, 32], strides = [1, 1]} : vector<8x128xf32> to vector<8x32xf32>
    %415 = vector.extract_strided_slice %411 {offsets = [0, 96], sizes = [8, 32], strides = [1, 1]} : vector<8x128xf32> to vector<8x32xf32>
    %416 = arith.mulf %413, %399 : vector<8x32xf32>
    %417 = arith.mulf %412, %414 : vector<8x32xf32>
    %418 = arith.addf %416, %417 : vector<8x32xf32>
    %419 = math.tanh %418 : vector<8x32xf32>
    %420 = arith.mulf %415, %419 : vector<8x32xf32>
    %c21_i32 = arith.constant 21 : i32
    %c8_i32_78 = arith.constant 8 : i32
    %421 = arith.muli %c21_i32, %c8_i32_78 : i32
    %422 = tpu.assume_multiple %421, 8 : i32
    %423 = arith.index_cast %422 : i32 to index
    %c0_79 = arith.constant 0 : index
    %424 = vector.load %arg11[%423, %c0_79] : memref<216x128xf32, #tpu.memory_space<vmem>>, vector<8x128xf32>
    %cst_80 = arith.constant dense<0.000000e+00> : vector<8x128xf32>
    %425 = tpu.matmul %420, %0, %cst_80 {dimension_numbers = #tpu.dot_dimension_numbers<[1], [0], [0], [1], [0, 0, 1, 1], [], []>} : vector<8x32xf32>, vector<32x128xf32>, vector<8x128xf32> -> vector<8x128xf32>
    %426 = arith.addf %424, %425 : vector<8x128xf32>
    %427 = arith.mulf %426, %16 : vector<8x128xf32>
    %428 = math.tanh %427 : vector<8x128xf32>
    %429 = arith.mulf %428, %16 : vector<8x128xf32>
    %430 = arith.addf %429, %19 : vector<8x128xf32>
    %431 = vector.extract_strided_slice %430 {offsets = [0, 0], sizes = [8, 32], strides = [1, 1]} : vector<8x128xf32> to vector<8x32xf32>
    %432 = vector.extract_strided_slice %430 {offsets = [0, 32], sizes = [8, 32], strides = [1, 1]} : vector<8x128xf32> to vector<8x32xf32>
    %433 = vector.extract_strided_slice %430 {offsets = [0, 64], sizes = [8, 32], strides = [1, 1]} : vector<8x128xf32> to vector<8x32xf32>
    %434 = vector.extract_strided_slice %430 {offsets = [0, 96], sizes = [8, 32], strides = [1, 1]} : vector<8x128xf32> to vector<8x32xf32>
    %435 = arith.mulf %432, %418 : vector<8x32xf32>
    %436 = arith.mulf %431, %433 : vector<8x32xf32>
    %437 = arith.addf %435, %436 : vector<8x32xf32>
    %438 = math.tanh %437 : vector<8x32xf32>
    %439 = arith.mulf %434, %438 : vector<8x32xf32>
    %c22_i32 = arith.constant 22 : i32
    %c8_i32_81 = arith.constant 8 : i32
    %440 = arith.muli %c22_i32, %c8_i32_81 : i32
    %441 = tpu.assume_multiple %440, 8 : i32
    %442 = arith.index_cast %441 : i32 to index
    %c0_82 = arith.constant 0 : index
    %443 = vector.load %arg11[%442, %c0_82] : memref<216x128xf32, #tpu.memory_space<vmem>>, vector<8x128xf32>
    %cst_83 = arith.constant dense<0.000000e+00> : vector<8x128xf32>
    %444 = tpu.matmul %439, %0, %cst_83 {dimension_numbers = #tpu.dot_dimension_numbers<[1], [0], [0], [1], [0, 0, 1, 1], [], []>} : vector<8x32xf32>, vector<32x128xf32>, vector<8x128xf32> -> vector<8x128xf32>
    %445 = arith.addf %443, %444 : vector<8x128xf32>
    %446 = arith.mulf %445, %16 : vector<8x128xf32>
    %447 = math.tanh %446 : vector<8x128xf32>
    %448 = arith.mulf %447, %16 : vector<8x128xf32>
    %449 = arith.addf %448, %19 : vector<8x128xf32>
    %450 = vector.extract_strided_slice %449 {offsets = [0, 0], sizes = [8, 32], strides = [1, 1]} : vector<8x128xf32> to vector<8x32xf32>
    %451 = vector.extract_strided_slice %449 {offsets = [0, 32], sizes = [8, 32], strides = [1, 1]} : vector<8x128xf32> to vector<8x32xf32>
    %452 = vector.extract_strided_slice %449 {offsets = [0, 64], sizes = [8, 32], strides = [1, 1]} : vector<8x128xf32> to vector<8x32xf32>
    %453 = vector.extract_strided_slice %449 {offsets = [0, 96], sizes = [8, 32], strides = [1, 1]} : vector<8x128xf32> to vector<8x32xf32>
    %454 = arith.mulf %451, %437 : vector<8x32xf32>
    %455 = arith.mulf %450, %452 : vector<8x32xf32>
    %456 = arith.addf %454, %455 : vector<8x32xf32>
    %457 = math.tanh %456 : vector<8x32xf32>
    %458 = arith.mulf %453, %457 : vector<8x32xf32>
    %c23_i32 = arith.constant 23 : i32
    %c8_i32_84 = arith.constant 8 : i32
    %459 = arith.muli %c23_i32, %c8_i32_84 : i32
    %460 = tpu.assume_multiple %459, 8 : i32
    %461 = arith.index_cast %460 : i32 to index
    %c0_85 = arith.constant 0 : index
    %462 = vector.load %arg11[%461, %c0_85] : memref<216x128xf32, #tpu.memory_space<vmem>>, vector<8x128xf32>
    %cst_86 = arith.constant dense<0.000000e+00> : vector<8x128xf32>
    %463 = tpu.matmul %458, %0, %cst_86 {dimension_numbers = #tpu.dot_dimension_numbers<[1], [0], [0], [1], [0, 0, 1, 1], [], []>} : vector<8x32xf32>, vector<32x128xf32>, vector<8x128xf32> -> vector<8x128xf32>
    %464 = arith.addf %462, %463 : vector<8x128xf32>
    %465 = arith.mulf %464, %16 : vector<8x128xf32>
    %466 = math.tanh %465 : vector<8x128xf32>
    %467 = arith.mulf %466, %16 : vector<8x128xf32>
    %468 = arith.addf %467, %19 : vector<8x128xf32>
    %469 = vector.extract_strided_slice %468 {offsets = [0, 0], sizes = [8, 32], strides = [1, 1]} : vector<8x128xf32> to vector<8x32xf32>
    %470 = vector.extract_strided_slice %468 {offsets = [0, 32], sizes = [8, 32], strides = [1, 1]} : vector<8x128xf32> to vector<8x32xf32>
    %471 = vector.extract_strided_slice %468 {offsets = [0, 64], sizes = [8, 32], strides = [1, 1]} : vector<8x128xf32> to vector<8x32xf32>
    %472 = vector.extract_strided_slice %468 {offsets = [0, 96], sizes = [8, 32], strides = [1, 1]} : vector<8x128xf32> to vector<8x32xf32>
    %473 = arith.mulf %470, %456 : vector<8x32xf32>
    %474 = arith.mulf %469, %471 : vector<8x32xf32>
    %475 = arith.addf %473, %474 : vector<8x32xf32>
    %476 = math.tanh %475 : vector<8x32xf32>
    %477 = arith.mulf %472, %476 : vector<8x32xf32>
    %c24_i32 = arith.constant 24 : i32
    %c8_i32_87 = arith.constant 8 : i32
    %478 = arith.muli %c24_i32, %c8_i32_87 : i32
    %479 = tpu.assume_multiple %478, 8 : i32
    %480 = arith.index_cast %479 : i32 to index
    %c0_88 = arith.constant 0 : index
    %481 = vector.load %arg11[%480, %c0_88] : memref<216x128xf32, #tpu.memory_space<vmem>>, vector<8x128xf32>
    %cst_89 = arith.constant dense<0.000000e+00> : vector<8x128xf32>
    %482 = tpu.matmul %477, %0, %cst_89 {dimension_numbers = #tpu.dot_dimension_numbers<[1], [0], [0], [1], [0, 0, 1, 1], [], []>} : vector<8x32xf32>, vector<32x128xf32>, vector<8x128xf32> -> vector<8x128xf32>
    %483 = arith.addf %481, %482 : vector<8x128xf32>
    %484 = arith.mulf %483, %16 : vector<8x128xf32>
    %485 = math.tanh %484 : vector<8x128xf32>
    %486 = arith.mulf %485, %16 : vector<8x128xf32>
    %487 = arith.addf %486, %19 : vector<8x128xf32>
    %488 = vector.extract_strided_slice %487 {offsets = [0, 0], sizes = [8, 32], strides = [1, 1]} : vector<8x128xf32> to vector<8x32xf32>
    %489 = vector.extract_strided_slice %487 {offsets = [0, 32], sizes = [8, 32], strides = [1, 1]} : vector<8x128xf32> to vector<8x32xf32>
    %490 = vector.extract_strided_slice %487 {offsets = [0, 64], sizes = [8, 32], strides = [1, 1]} : vector<8x128xf32> to vector<8x32xf32>
    %491 = vector.extract_strided_slice %487 {offsets = [0, 96], sizes = [8, 32], strides = [1, 1]} : vector<8x128xf32> to vector<8x32xf32>
    %492 = arith.mulf %489, %475 : vector<8x32xf32>
    %493 = arith.mulf %488, %490 : vector<8x32xf32>
    %494 = arith.addf %492, %493 : vector<8x32xf32>
    %495 = math.tanh %494 : vector<8x32xf32>
    %496 = arith.mulf %491, %495 : vector<8x32xf32>
    %c25_i32 = arith.constant 25 : i32
    %c8_i32_90 = arith.constant 8 : i32
    %497 = arith.muli %c25_i32, %c8_i32_90 : i32
    %498 = tpu.assume_multiple %497, 8 : i32
    %499 = arith.index_cast %498 : i32 to index
    %c0_91 = arith.constant 0 : index
    %500 = vector.load %arg11[%499, %c0_91] : memref<216x128xf32, #tpu.memory_space<vmem>>, vector<8x128xf32>
    %cst_92 = arith.constant dense<0.000000e+00> : vector<8x128xf32>
    %501 = tpu.matmul %496, %0, %cst_92 {dimension_numbers = #tpu.dot_dimension_numbers<[1], [0], [0], [1], [0, 0, 1, 1], [], []>} : vector<8x32xf32>, vector<32x128xf32>, vector<8x128xf32> -> vector<8x128xf32>
    %502 = arith.addf %500, %501 : vector<8x128xf32>
    %503 = arith.mulf %502, %16 : vector<8x128xf32>
    %504 = math.tanh %503 : vector<8x128xf32>
    %505 = arith.mulf %504, %16 : vector<8x128xf32>
    %506 = arith.addf %505, %19 : vector<8x128xf32>
    %507 = vector.extract_strided_slice %506 {offsets = [0, 0], sizes = [8, 32], strides = [1, 1]} : vector<8x128xf32> to vector<8x32xf32>
    %508 = vector.extract_strided_slice %506 {offsets = [0, 32], sizes = [8, 32], strides = [1, 1]} : vector<8x128xf32> to vector<8x32xf32>
    %509 = vector.extract_strided_slice %506 {offsets = [0, 64], sizes = [8, 32], strides = [1, 1]} : vector<8x128xf32> to vector<8x32xf32>
    %510 = vector.extract_strided_slice %506 {offsets = [0, 96], sizes = [8, 32], strides = [1, 1]} : vector<8x128xf32> to vector<8x32xf32>
    %511 = arith.mulf %508, %494 : vector<8x32xf32>
    %512 = arith.mulf %507, %509 : vector<8x32xf32>
    %513 = arith.addf %511, %512 : vector<8x32xf32>
    %514 = math.tanh %513 : vector<8x32xf32>
    %515 = arith.mulf %510, %514 : vector<8x32xf32>
    %c26_i32 = arith.constant 26 : i32
    %c8_i32_93 = arith.constant 8 : i32
    %516 = arith.muli %c26_i32, %c8_i32_93 : i32
    %517 = tpu.assume_multiple %516, 8 : i32
    %518 = arith.index_cast %517 : i32 to index
    %c0_94 = arith.constant 0 : index
    %519 = vector.load %arg11[%518, %c0_94] : memref<216x128xf32, #tpu.memory_space<vmem>>, vector<8x128xf32>
    %cst_95 = arith.constant dense<0.000000e+00> : vector<8x128xf32>
    %520 = tpu.matmul %515, %0, %cst_95 {dimension_numbers = #tpu.dot_dimension_numbers<[1], [0], [0], [1], [0, 0, 1, 1], [], []>} : vector<8x32xf32>, vector<32x128xf32>, vector<8x128xf32> -> vector<8x128xf32>
    %521 = arith.addf %519, %520 : vector<8x128xf32>
    %522 = arith.mulf %521, %16 : vector<8x128xf32>
    %523 = math.tanh %522 : vector<8x128xf32>
    %524 = arith.mulf %523, %16 : vector<8x128xf32>
    %525 = arith.addf %524, %19 : vector<8x128xf32>
    %526 = vector.extract_strided_slice %525 {offsets = [0, 0], sizes = [8, 32], strides = [1, 1]} : vector<8x128xf32> to vector<8x32xf32>
    %527 = vector.extract_strided_slice %525 {offsets = [0, 32], sizes = [8, 32], strides = [1, 1]} : vector<8x128xf32> to vector<8x32xf32>
    %528 = vector.extract_strided_slice %525 {offsets = [0, 64], sizes = [8, 32], strides = [1, 1]} : vector<8x128xf32> to vector<8x32xf32>
    %529 = vector.extract_strided_slice %525 {offsets = [0, 96], sizes = [8, 32], strides = [1, 1]} : vector<8x128xf32> to vector<8x32xf32>
    %530 = arith.mulf %527, %513 : vector<8x32xf32>
    %531 = arith.mulf %526, %528 : vector<8x32xf32>
    %532 = arith.addf %530, %531 : vector<8x32xf32>
    %533 = math.tanh %532 : vector<8x32xf32>
    %534 = arith.mulf %529, %533 : vector<8x32xf32>
    %c27_i32 = arith.constant 27 : i32
    %c0_96 = arith.constant 0 : index
    %c0_97 = arith.constant 0 : index
    %535 = vector.load %arg4[%c0_96, %c0_97] : memref<32x128xf32, #tpu.memory_space<vmem>>, vector<32x128xf32>
    %cst_98 = arith.constant dense<0.000000e+00> : vector<8x128xf32>
    %536 = tpu.matmul %534, %535, %cst_98 {dimension_numbers = #tpu.dot_dimension_numbers<[1], [0], [0], [1], [0, 0, 1, 1], [], []>} : vector<8x32xf32>, vector<32x128xf32>, vector<8x128xf32> -> vector<8x128xf32>
    %c0_99 = arith.constant 0 : index
    %c0_100 = arith.constant 0 : index
    %537 = vector.load %arg5[%c0_99, %c0_100] : memref<1x128xf32, #tpu.memory_space<vmem>>, vector<1x128xf32>
    %538 = vector.broadcast %537 : vector<1x128xf32> to vector<8x128xf32>
    %539 = arith.addf %536, %538 : vector<8x128xf32>
    %cst_101 = arith.constant 0.000000e+00 : f32
    %540 = vector.broadcast %cst_101 : f32 to vector<8x128xf32>
    %541 = arith.cmpf ogt, %539, %540 : vector<8x128xf32>
    %542 = math.exp %539 : vector<8x128xf32>
    %cst_102 = arith.constant 1.000000e+00 : f32
    %543 = vector.broadcast %cst_102 : f32 to vector<8x128xf32>
    %544 = arith.subf %542, %543 : vector<8x128xf32>
    %545 = arith.select %541, %539, %544 : vector<8x128xi1>, vector<8x128xf32>
    %c0_103 = arith.constant 0 : index
    %c0_104 = arith.constant 0 : index
    %546 = vector.load %arg6[%c0_103, %c0_104] : memref<128x128xf32, #tpu.memory_space<vmem>>, vector<128x128xf32>
    %cst_105 = arith.constant dense<0.000000e+00> : vector<8x128xf32>
    %547 = tpu.matmul %545, %546, %cst_105 {dimension_numbers = #tpu.dot_dimension_numbers<[1], [0], [0], [1], [0, 0, 1, 1], [], []>} : vector<8x128xf32>, vector<128x128xf32>, vector<8x128xf32> -> vector<8x128xf32>
    %c0_106 = arith.constant 0 : index
    %c0_107 = arith.constant 0 : index
    %548 = vector.load %arg7[%c0_106, %c0_107] : memref<1x128xf32, #tpu.memory_space<vmem>>, vector<1x128xf32>
    %549 = vector.broadcast %548 : vector<1x128xf32> to vector<8x128xf32>
    %550 = arith.addf %547, %549 : vector<8x128xf32>
    %cst_108 = arith.constant 0.000000e+00 : f32
    %551 = vector.broadcast %cst_108 : f32 to vector<8x128xf32>
    %552 = arith.cmpf ogt, %550, %551 : vector<8x128xf32>
    %553 = math.exp %550 : vector<8x128xf32>
    %cst_109 = arith.constant 1.000000e+00 : f32
    %554 = vector.broadcast %cst_109 : f32 to vector<8x128xf32>
    %555 = arith.subf %553, %554 : vector<8x128xf32>
    %556 = arith.select %552, %550, %555 : vector<8x128xi1>, vector<8x128xf32>
    %c0_110 = arith.constant 0 : index
    %c0_111 = arith.constant 0 : index
    %557 = vector.load %arg8[%c0_110, %c0_111] : memref<128x128xf32, #tpu.memory_space<vmem>>, vector<128x128xf32>
    %cst_112 = arith.constant dense<0.000000e+00> : vector<8x128xf32>
    %558 = tpu.matmul %556, %557, %cst_112 {dimension_numbers = #tpu.dot_dimension_numbers<[1], [0], [0], [1], [0, 0, 1, 1], [], []>} : vector<8x128xf32>, vector<128x128xf32>, vector<8x128xf32> -> vector<8x128xf32>
    %c0_113 = arith.constant 0 : index
    %c0_114 = arith.constant 0 : index
    %559 = vector.load %arg9[%c0_113, %c0_114] : memref<1x128xf32, #tpu.memory_space<vmem>>, vector<1x128xf32>
    %560 = vector.broadcast %559 : vector<1x128xf32> to vector<8x128xf32>
    %561 = arith.addf %558, %560 : vector<8x128xf32>
    %cst_115 = arith.constant 0.000000e+00 : f32
    %562 = vector.broadcast %cst_115 : f32 to vector<8x128xf32>
    %563 = arith.cmpf ogt, %561, %562 : vector<8x128xf32>
    %564 = math.exp %561 : vector<8x128xf32>
    %cst_116 = arith.constant 1.000000e+00 : f32
    %565 = vector.broadcast %cst_116 : f32 to vector<8x128xf32>
    %566 = arith.subf %564, %565 : vector<8x128xf32>
    %567 = arith.select %563, %561, %566 : vector<8x128xi1>, vector<8x128xf32>
    %c0_117 = arith.constant 0 : index
    %c0_118 = arith.constant 0 : index
    %568 = vector.load %arg10[%c0_117, %c0_118] : memref<8x128xf32, #tpu.memory_space<vmem>>, vector<8x128xf32>
    tpu.vector_store %arg10[%c0_117, %c0_118], %567 {strides = array<i32>} : memref<8x128xf32, #tpu.memory_space<vmem>>, vector<8x128xf32>,
    return
  }
}

</mosaic_0001>

<bundles_post_ra>
// kernel: tpu_custom_call.1
= control target key start
LH: loop header
LB: loop body
LE: loop exit
PB: predicated region body
PF: predicated region fallthrough
CT: control target
= control target key end

     0   :  { %15 = vsyncpa [#allocation4], 0  ;;  %s2699_s0 = inlined_call_operand.vmem [shape: f32[216,8], index: 0, kind: input, shape index: {}]   ;;  %s2700_s1 = inlined_call_operand.vmem [shape: f32[8,128], index: 1, kind: input, shape index: {}]   ;;  %s2701_s2 = inlined_call_operand.vmem [shape: f32[32,128], index: 2, kind: input, shape index: {}]   ;;  %s2702_s3 = inlined_call_operand.vmem [shape: f32[1,128], index: 3, kind: input, shape index: {}]   ;;  %s2703_s4 = inlined_call_operand.vmem [shape: f32[32,128], index: 4, kind: input, shape index: {}]   ;;  %s2704_s5 = inlined_call_operand.vmem [shape: f32[1,128], index: 5, kind: input, shape index: {}]   ;;  %s2705_s6 = inlined_call_operand.vmem [shape: f32[128,128], index: 6, kind: input, shape index: {}]   ;;  %s2706_s7 = inlined_call_operand.vmem [shape: f32[1,128], index: 7, kind: input, shape index: {}]   ;;  %s2707_s8 = inlined_call_operand.hbm [shape: f32[128,128], index: 8, kind: input, shape index: {}]   ;;  %s2708_s9 = inlined_call_operand.vmem [shape: f32[1,128], index: 9, kind: input, shape index: {}]   ;;  %s2709_s10 = inlined_call_operand.hbm [shape: f32[8,128], index: 10, kind: output, shape index: {}]  }
   0x1   :  { %16 = vsyncpa [#allocation5], 0  ;;  %s37_s15 = sshll.u32 %s2707_s8, 4  ;;  %s2012_s16 = smov [#allocation3]   ;;  %s38_s15 = int_to_ptr.hbm [resolvable:$true] %s37_s15 }
   0x2   :  { %s39_s17 = sshll.u32 %s2012_s16, 4  ;;  %s2013_s18 = smov 128   ;;  %s40_s17 = int_to_ptr.vmem [resolvable:$true] %s39_s17 }
   0x3   :  { %s2014_s19 = smov 8  }
   0x4   :  { %45 = dma.hbm_to_vmem [thread:$0]  %s38_s15, 2048, %s40_s17, [#allocation4], %s2013_s18, %s2013_s18, %s2014_s19  }
   0x5   :  { %2008 = dma.done.wait [#allocation4], 2048  }
   0x6   :  { %2009 = vsyncadd [#allocation4], 4294965248  ;;  %vm88_vm0 = vcmask 64512   ;;  %v83_v0 = vld [vmem:[%s2700_s1] sm:$0xff]  ;;  %v2087_v2 = vld [vmem:[%s2701_s2 + $0x18] sm:$0xff]  ;;  %v2015_v12 = vmov 0.0   ;;  %v295_v18 = vlaneseq }
   0x7   :  { %v72_v1 = vld [vmem:[%s2699_s0 + $0x80] sm:$0xff]  ;;  %1826 = vmatpush.msra.mxu1 %v83_v0  ;;  %185 = vmatpush.msra.mxu0 %v83_v0  ;;  %v2093_v3 = vld [vmem:[%s2701_s2 + $0x10] sm:$0xff]  ;;  %v2099_v4 = vld [vmem:[%s2701_s2 + $0x8] sm:$0xff]  ;;  %v2016_v24 = vmov 0.5   ;;  %s2017_s24 = smov 64   ;;  %s2018_s8 = smov 32  }
   0x8   :  { %1785 = vmatmul.msk.f32.vlgmr.msra.gmra.mxu1 %vm88_vm0, %v72_v1  ;;  %1827 = vmatpush.msra.mxu2 %v83_v0  ;;  %v2107_v5 = vld [vmem:[%s2701_s2] sm:$0xff]  ;;  %v73_v6 = vld [vmem:[%s2699_s0 + $0x88] sm:$0xff]  ;;  %v74_v8 = vld [vmem:[%s2699_s0 + $0x90] sm:$0xff]  ;;  %v296_v19 = vand.u32 127, %v295_v18  ;;  %vm303_vm4 = vcmask 261120   ;;  %s2019_s1 = smov [#allocation6]  }
   0x9   :  { %319 = vmatpush.msrb.mxu1 %v2087_v2  ;;  %1828 = vmatpush.msra.mxu3 %v83_v0  ;;  %v56_v7 = vld [vmem:[%s2699_s0] sm:$0xff]  ;;  %v75_v9 = vld [vmem:[%s2699_s0 + $0x98] sm:$0xff]  ;;  %v77_v11 = vld [vmem:[%s2699_s0 + $0xa8] sm:$0xff]  ;;  %s1757_s27 = sshll.u32 %s2019_s1, 4  ;;  %s1759_s28 = sshll.u32 %s2709_s10, 4  ;;  %s1758_s27 = int_to_ptr.vmem [resolvable:$true] %s1757_s27  ;;  %s1760_s28 = int_to_ptr.hbm [resolvable:$true] %s1759_s28 }
   0xa   :  { %368 = vmatpush.msrb.mxu2 %v2087_v2  ;;  %1769 = vmatmul.msk.f32.vlgmr.msra.gmra.mxu0 %vm88_vm0, %v56_v7  ;;  %v76_v10 = vld [vmem:[%s2699_s0 + $0xa0] sm:$0xff]  ;;  %vm297_vm1 = vcmp.ge.s32.totalorder %v296_v19, 64  ;;  %vm298_vm2 = vcmp.lt.s32.totalorder %v296_v19, 96  ;;  %v78_v39 = vld [vmem:[%s2699_s0 + $0xb0] sm:$0xff]  ;;  %v79_v40 = vld [vmem:[%s2699_s0 + $0xb8] sm:$0xff] }
   0xb   :  { %320 = vmatpush.msrb.mxu1 %v2093_v3  ;;  %417 = vmatpush.msrb.mxu3 %v2087_v2  ;;  %v2164_v22 = vld [vmem:[%s2702_s3] ss:$0 sm:$0xff]  ;;  %vm299_vm3 = vmand %vm297_vm1, %vm298_vm2  ;;  %v57_v44 = vld [vmem:[%s2699_s0 + $0x8] sm:$0xff] }
   0xc   :  { %369 = vmatpush.msrb.mxu2 %v2093_v3  ;;  %v2167_v25 = vsel %vm299_vm3, 1.0, %v2016_v24  ;;  %v2170_v30 = vsel %vm299_vm3, 0.0, %v2016_v24  ;;  %v80_v41 = vld [vmem:[%s2699_s0 + $0xc0] sm:$0xff]  ;;  %v81_v63 = vld [vmem:[%s2699_s0 + $0xc8] sm:$0xff]  ;;  %v82_v0 = vld [vmem:[%s2699_s0 + $0xd0] sm:$0xff] }
   0xd   :  { %321 = vmatpush.msrb.mxu1 %v2099_v4  ;;  %418 = vmatpush.msrb.mxu3 %v2093_v3  ;;  %v58_v7 = vld [vmem:[%s2699_s0 + $0x10] sm:$0xff] }
   0xe   :  { %370 = vmatpush.msrb.mxu2 %v2099_v4  ;;  %1794 = vmatmul.msk.f32.vlgmr.msra.gmra.mxu3 %vm88_vm0, %v81_v63 }
   0xf   :  { %322 = vmatpush.msrb.mxu1 %v2107_v5  ;;  %419 = vmatpush.msrb.mxu3 %v2099_v4 }
  0x10   :  { %371 = vmatpush.msrb.mxu2 %v2107_v5  ;;  %1786 = vmatmul.msk.f32.gmra.mxu1 %vm88_vm0, %v73_v6 }
  0x11   :  { %466 = vmatpush.msra.mxu1 %v2087_v2  ;;  %420 = vmatpush.msrb.mxu3 %v2107_v5 }
  0x12   :  { %1791 = vmatmul.msk.f32.vlgmr.msra.gmra.mxu2 %vm88_vm0, %v78_v39  ;;  %1770 = vmatmul.msk.f32.gmra.mxu0 %vm88_vm0, %v57_v44 }
  0x13   :  { %467 = vmatpush.msra.mxu1 %v2093_v3  ;;  %515 = vmatpush.msra.mxu2 %v2087_v2 }
  0x14   :  { %564 = vmatpush.msra.mxu3 %v2087_v2 }
  0x15   :  { %468 = vmatpush.msra.mxu1 %v2099_v4  ;;  %516 = vmatpush.msra.mxu2 %v2093_v3 }
  0x16   :  { %565 = vmatpush.msra.mxu3 %v2093_v3 }
  0x17   :  { %469 = vmatpush.msra.mxu1 %v2107_v5  ;;  %517 = vmatpush.msra.mxu2 %v2099_v4 }
  0x18   :  { %1787 = vmatmul.msk.f32.gmra.mxu1 %vm88_vm0, %v74_v8  ;;  %566 = vmatpush.msra.mxu3 %v2099_v4 }
  0x19   :  { %518 = vmatpush.msra.mxu2 %v2107_v5  ;;  %1795 = vmatmul.msk.f32.gmra.mxu3 %vm88_vm0, %v82_v0 }
  0x1a   :  { %1792 = vmatmul.msk.f32.gmra.mxu2 %vm88_vm0, %v79_v40  ;;  %567 = vmatpush.msra.mxu3 %v2107_v5 }
  0x1b   :  { %1771 = vmatmul.msk.f32.gmra.mxu0 %vm88_vm0, %v58_v7 }
  0x20   :  { %1788 = vmatmul.msk.f32.gmra.mxu1 %vm88_vm0, %v75_v9 }
  0x22   :  { %1793 = vmatmul.msk.f32.gmra.mxu2 %vm88_vm0, %v80_v41 }
  0x28   :  { %1789 = vmatmul.msk.f32.gmra.mxu1 %vm88_vm0, %v76_v10 }
  0x30   :  { %1790 = vmatmul.msk.f32.gmra.mxu1 %vm88_vm0, %v77_v11 }
  0x38   :  { %323 = vmatmul.f32.vlgmr.msrb.gmra.mxu1 %v2015_v12 }
  0x39   :  { %613 = vmatpush.msrb.mxu1 %v2087_v2 }
  0x3b   :  { %614 = vmatpush.msrb.mxu1 %v2093_v3 }
  0x3d   :  { %615 = vmatpush.msrb.mxu1 %v2099_v4 }
  0x3f   :  { %616 = vmatpush.msrb.mxu1 %v2107_v5 }
  0x85   :  { %v2149_v13 = vpop.f32.mrf.mxu1 }
  0x87   :  { %v187_v21 = vpop.f32.mrf.mxu0 }
  0x88   :  { %v188_v23 = vadd.f32 %v2164_v22, %v187_v21 }
  0x8d   :  { %v2151_v14 = vpop.f32.mrf.mxu1 }
  0x8f   :  { %v190_v49 = vpop.f32.mrf.mxu0 }
  0x90   :  { %v191_v50 = vadd.f32 %v2164_v22, %v190_v49 }
  0x91   :  { %v2238_v9 = vpop.f32.mrf.mxu3 }
  0x95   :  { %v2153_v15 = vpop.f32.mrf.mxu1  ;;  %v2203_v46 = vpop.f32.mrf.mxu2 }
  0x98   :  { %v193_v11 = vpop.f32.mrf.mxu0 }
  0x99   :  { %v194_v12 = vadd.f32 %v2164_v22, %v193_v11 }
  0x9c   :  { %v2240_v10 = vpop.f32.mrf.mxu3 }
  0x9d   :  { %v2155_v16 = vpop.f32.mrf.mxu1  ;;  %v2205_v47 = vpop.f32.mrf.mxu2 }
  0xa5   :  { %v2157_v17 = vpop.f32.mrf.mxu1  ;;  %v2207_v48 = vpop.f32.mrf.mxu2 }
  0xad   :  { %v2159_v20 = vpop.f32.mrf.mxu1 }
  0xb5   :  { %v324_v26 = vpop.f32.mrf.mxu1 }
  0xb6   :  { %v327_v27 = vadd.f32 %v324_v26, %v188_v23 }
  0xb8   :  { %v328_v28 = vmul.f32 %v327_v27, %v2167_v25 }
  0xba   :  { %1841 = vtanh.f32 %v328_v28 }
  0xc0   :  { %v1842_v29 = vpop.eup %1841 }
  0xc1   :  { %v330_v31 = vmul.f32 %v1842_v29, %v2167_v25 }
  0xc3   :  { %v331_v32 = vadd.f32 %v330_v31, %v2170_v30 }
  0xc5   :  { %334 = vrot.lane.b32.xlu0 %v331_v32, %s2017_s24  ;;  %v332_v35 = vmul.f32 0.0, %v331_v32 }
 0x137   :  { %v335_v33 = vpop.permute.xlu0 %334 }
 0x138   :  { %v337_v34 = vmul.f32 %v335_v33, %v331_v32 }
 0x13a   :  { %339 = vrot.lane.b32.xlu0 %v337_v34, %s2018_s8  ;;  %v59_v34 = vld [vmem:[%s2699_s0 + $0x18] sm:$0xff] }
 0x13b   :  { %1772 = vmatmul.msk.f32.gmra.mxu0 %vm88_vm0, %v59_v34 }
 0x1ac   :  { %v340_v36 = vpop.permute.xlu0 %339 }
 0x1ad   :  { %v342_v37 = vadd.f32 %v340_v36, %v332_v35 }
 0x1af   :  { %1843 = vtanh.f32 %v342_v37 }
 0x1b5   :  { %v1844_v38 = vpop.eup %1843 }
 0x1b6   :  { %345 = vrot.lane.b32.xlu1 %v1844_v38, %s2017_s24 }
 0x1b8   :  { %v196_v38 = vpop.f32.mrf.mxu0 }
 0x1b9   :  { %v197_v39 = vadd.f32 %v2164_v22, %v196_v38 }
 0x228   :  { %v346_v42 = vpop.permute.xlu1 %345 }
 0x229   :  { %v348_v43 = vmul.f32 %v346_v42, %v331_v32 }
 0x22b   :  { %352 = vrot.lane.b32.xlu1 %v348_v43, %s2018_s8 }
 0x29d   :  { %v353_v45 = vpop.permute.xlu1 %352 }
 0x29e   :  { %1796 = vmatmul.msk.f32.vlgmr.msrb.gmra.mxu2 %vm303_vm4, %v353_v45 }
 0x29f   :  { %662 = vmatpush.msrb.mxu2 %v2087_v2 }
 0x2a1   :  { %663 = vmatpush.msrb.mxu2 %v2093_v3 }
 0x2a3   :  { %664 = vmatpush.msrb.mxu2 %v2099_v4 }
 0x2a5   :  { %665 = vmatpush.msrb.mxu2 %v2107_v5 }
 0x321   :  { %v373_v51 = vpop.f32.mrf.mxu2 }
 0x322   :  { %v376_v52 = vadd.f32 %v373_v51, %v191_v50 }
 0x324   :  { %v377_v53 = vmul.f32 %v376_v52, %v2167_v25 }
 0x326   :  { %1845 = vtanh.f32 %v377_v53 }
 0x32c   :  { %v1846_v54 = vpop.eup %1845 }
 0x32d   :  { %v379_v55 = vmul.f32 %v1846_v54, %v2167_v25 }
 0x32f   :  { %v380_v56 = vadd.f32 %v379_v55, %v2170_v30 }
 0x331   :  { %383 = vrot.lane.b32.xlu2 %v380_v56, %s2017_s24  ;;  %v381_v59 = vmul.f32 %v380_v56, %v342_v37 }
 0x38b   :  { %v384_v57 = vpop.permute.xlu2 %383 }
 0x38c   :  { %v386_v58 = vmul.f32 %v384_v57, %v380_v56  ;;  %v60_v57 = vld [vmem:[%s2699_s0 + $0x20] sm:$0xff] }
 0x38d   :  { %1773 = vmatmul.msk.f32.gmra.mxu0 %vm88_vm0, %v60_v57 }
 0x38e   :  { %388 = vrot.lane.b32.xlu2 %v386_v58, %s2018_s8 }
 0x3e8   :  { %v389_v60 = vpop.permute.xlu2 %388 }
 0x3e9   :  { %v391_v61 = vadd.f32 %v389_v60, %v381_v59 }
 0x3eb   :  { %1847 = vtanh.f32 %v391_v61 }
 0x3f1   :  { %v1848_v62 = vpop.eup %1847 }
 0x3f2   :  { %394 = vrot.lane.b32.xlu0 %v1848_v62, %s2017_s24 }
 0x40a   :  { %v199_v59 = vpop.f32.mrf.mxu0 }
 0x40b   :  { %v200_v60 = vadd.f32 %v2164_v22, %v199_v59 }
 0x464   :  { %v395_v1 = vpop.permute.xlu0 %394 }
 0x465   :  { %v397_v6 = vmul.f32 %v395_v1, %v380_v56 }
 0x467   :  { %401 = vrot.lane.b32.xlu1 %v397_v6, %s2018_s8 }
 0x4d9   :  { %v402_v8 = vpop.permute.xlu1 %401 }
 0x4da   :  { %1797 = vmatmul.msk.f32.vlgmr.msrb.gmra.mxu3 %vm303_vm4, %v402_v8 }
 0x4db   :  { %711 = vmatpush.msrb.mxu3 %v2087_v2 }
 0x4dd   :  { %712 = vmatpush.msrb.mxu3 %v2093_v3 }
 0x4df   :  { %713 = vmatpush.msrb.mxu3 %v2099_v4 }
 0x4e1   :  { %714 = vmatpush.msrb.mxu3 %v2107_v5 }
 0x55d   :  { %v422_v18 = vpop.f32.mrf.mxu3 }
 0x55e   :  { %v425_v19 = vadd.f32 %v422_v18, %v194_v12 }
 0x560   :  { %v426_v21 = vmul.f32 %v425_v19, %v2167_v25 }
 0x562   :  { %1849 = vtanh.f32 %v426_v21 }
 0x568   :  { %v1850_v23 = vpop.eup %1849 }
 0x569   :  { %v428_v24 = vmul.f32 %v1850_v23, %v2167_v25 }
 0x56b   :  { %v429_v26 = vadd.f32 %v428_v24, %v2170_v30  ;;  %v61_v24 = vld [vmem:[%s2699_s0 + $0x28] sm:$0xff] }
 0x56c   :  { %1774 = vmatmul.msk.f32.gmra.mxu0 %vm88_vm0, %v61_v24 }
 0x56d   :  { %432 = vrot.lane.b32.xlu2 %v429_v26, %s2017_s24  ;;  %v430_v29 = vmul.f32 %v429_v26, %v391_v61 }
 0x5c7   :  { %v433_v27 = vpop.permute.xlu2 %432 }
 0x5c8   :  { %v435_v28 = vmul.f32 %v433_v27, %v429_v26 }
 0x5ca   :  { %437 = vrot.lane.b32.xlu0 %v435_v28, %s2018_s8 }
 0x5e9   :  { %v202_v27 = vpop.f32.mrf.mxu0 }
 0x5ea   :  { %v203_v28 = vadd.f32 %v2164_v22, %v202_v27 }
 0x63c   :  { %v438_v31 = vpop.permute.xlu0 %437 }
 0x63d   :  { %v440_v32 = vadd.f32 %v438_v31, %v430_v29 }
 0x63f   :  { %1851 = vtanh.f32 %v440_v32 }
 0x645   :  { %v1852_v33 = vpop.eup %1851 }
 0x646   :  { %443 = vrot.lane.b32.xlu1 %v1852_v33, %s2017_s24 }
 0x6b8   :  { %v444_v35 = vpop.permute.xlu1 %443 }
 0x6b9   :  { %v446_v36 = vmul.f32 %v444_v35, %v429_v26 }
 0x6bb   :  { %450 = vrot.lane.b32.xlu2 %v446_v36, %s2018_s8 }
 0x715   :  { %v451_v37 = vpop.permute.xlu2 %450 }
 0x716   :  { %1798 = vmatmul.msk.f32.vlgmr.msra.gmra.mxu1 %vm303_vm4, %v451_v37 }
 0x717   :  { %760 = vmatpush.msra.mxu1 %v2087_v2 }
 0x719   :  { %761 = vmatpush.msra.mxu1 %v2093_v3 }
 0x71b   :  { %762 = vmatpush.msra.mxu1 %v2099_v4 }
 0x71d   :  { %763 = vmatpush.msra.mxu1 %v2107_v5 }
 0x793   :  { %v471_v40 = vpop.f32.mrf.mxu1 }
 0x794   :  { %v474_v41 = vadd.f32 %v471_v40, %v197_v39 }
 0x796   :  { %v475_v42 = vmul.f32 %v474_v41, %v2167_v25 }
 0x798   :  { %1853 = vtanh.f32 %v475_v42  ;;  %v62_v42 = vld [vmem:[%s2699_s0 + $0x30] sm:$0xff] }
 0x799   :  { %1775 = vmatmul.msk.f32.gmra.mxu0 %vm88_vm0, %v62_v42 }
 0x79e   :  { %v1854_v43 = vpop.eup %1853 }
 0x79f   :  { %v477_v44 = vmul.f32 %v1854_v43, %v2167_v25 }
 0x7a1   :  { %v478_v45 = vadd.f32 %v477_v44, %v2170_v30 }
 0x7a3   :  { %481 = vrot.lane.b32.xlu0 %v478_v45, %s2017_s24  ;;  %v479_v51 = vmul.f32 %v478_v45, %v440_v32 }
 0x815   :  { %v482_v49 = vpop.permute.xlu0 %481 }
 0x816   :  { %v484_v50 = vmul.f32 %v482_v49, %v478_v45  ;;  %v205_v49 = vpop.f32.mrf.mxu0 }
 0x818   :  { %486 = vrot.lane.b32.xlu1 %v484_v50, %s2018_s8  ;;  %v206_v50 = vadd.f32 %v2164_v22, %v205_v49 }
 0x88a   :  { %v487_v52 = vpop.permute.xlu1 %486 }
 0x88b   :  { %v489_v53 = vadd.f32 %v487_v52, %v479_v51 }
 0x88d   :  { %1855 = vtanh.f32 %v489_v53 }
 0x893   :  { %v1856_v54 = vpop.eup %1855 }
 0x894   :  { %492 = vrot.lane.b32.xlu2 %v1856_v54, %s2017_s24 }
 0x8ee   :  { %v493_v55 = vpop.permute.xlu2 %492 }
 0x8ef   :  { %v495_v56 = vmul.f32 %v493_v55, %v478_v45 }
 0x8f1   :  { %499 = vrot.lane.b32.xlu0 %v495_v56, %s2018_s8 }
 0x963   :  { %v500_v58 = vpop.permute.xlu0 %499 }
 0x964   :  { %1799 = vmatmul.msk.f32.vlgmr.msra.gmra.mxu2 %vm303_vm4, %v500_v58 }
 0x965   :  { %809 = vmatpush.msra.mxu2 %v2087_v2 }
 0x967   :  { %810 = vmatpush.msra.mxu2 %v2093_v3 }
 0x969   :  { %811 = vmatpush.msra.mxu2 %v2099_v4 }
 0x96b   :  { %812 = vmatpush.msra.mxu2 %v2107_v5 }
 0x9e7   :  { %v520_v61 = vpop.f32.mrf.mxu2 }
 0x9e8   :  { %v523_v62 = vadd.f32 %v520_v61, %v200_v60 }
 0x9ea   :  { %v524_v63 = vmul.f32 %v523_v62, %v2167_v25 }
 0x9ec   :  { %1857 = vtanh.f32 %v524_v63 }
 0x9f2   :  { %v1858_v0 = vpop.eup %1857 }
 0x9f3   :  { %v526_v1 = vmul.f32 %v1858_v0, %v2167_v25 }
 0x9f5   :  { %v527_v6 = vadd.f32 %v526_v1, %v2170_v30  ;;  %v63_v1 = vld [vmem:[%s2699_s0 + $0x38] sm:$0xff] }
 0x9f6   :  { %1776 = vmatmul.msk.f32.gmra.mxu0 %vm88_vm0, %v63_v1 }
 0x9f7   :  { %530 = vrot.lane.b32.xlu1 %v527_v6, %s2017_s24  ;;  %v528_v11 = vmul.f32 %v527_v6, %v489_v53 }
 0xa69   :  { %v531_v7 = vpop.permute.xlu1 %530 }
 0xa6a   :  { %v533_v8 = vmul.f32 %v531_v7, %v527_v6 }
 0xa6c   :  { %535 = vrot.lane.b32.xlu2 %v533_v8, %s2018_s8 }
 0xa73   :  { %v208_v7 = vpop.f32.mrf.mxu0 }
 0xa74   :  { %v209_v8 = vadd.f32 %v2164_v22, %v208_v7 }
 0xac6   :  { %v536_v12 = vpop.permute.xlu2 %535 }
 0xac7   :  { %v538_v18 = vadd.f32 %v536_v12, %v528_v11 }
 0xac9   :  { %1859 = vtanh.f32 %v538_v18 }
 0xacf   :  { %v1860_v19 = vpop.eup %1859 }
 0xad0   :  { %541 = vrot.lane.b32.xlu0 %v1860_v19, %s2017_s24 }
 0xb42   :  { %v542_v21 = vpop.permute.xlu0 %541 }
 0xb43   :  { %v544_v23 = vmul.f32 %v542_v21, %v527_v6 }
 0xb45   :  { %548 = vrot.lane.b32.xlu1 %v544_v23, %s2018_s8 }
 0xbb7   :  { %v549_v26 = vpop.permute.xlu1 %548 }
 0xbb8   :  { %1800 = vmatmul.msk.f32.vlgmr.msra.gmra.mxu3 %vm303_vm4, %v549_v26 }
 0xbb9   :  { %858 = vmatpush.msra.mxu3 %v2087_v2 }
 0xbbb   :  { %859 = vmatpush.msra.mxu3 %v2093_v3 }
 0xbbd   :  { %860 = vmatpush.msra.mxu3 %v2099_v4 }
 0xbbf   :  { %861 = vmatpush.msra.mxu3 %v2107_v5 }
 0xc3b   :  { %v569_v29 = vpop.f32.mrf.mxu3 }
 0xc3c   :  { %v572_v31 = vadd.f32 %v569_v29, %v203_v28 }
 0xc3e   :  { %v573_v32 = vmul.f32 %v572_v31, %v2167_v25 }
 0xc40   :  { %1861 = vtanh.f32 %v573_v32 }
 0xc46   :  { %v1862_v33 = vpop.eup %1861 }
 0xc47   :  { %v575_v34 = vmul.f32 %v1862_v33, %v2167_v25 }
 0xc49   :  { %v576_v35 = vadd.f32 %v575_v34, %v2170_v30  ;;  %v64_v34 = vld [vmem:[%s2699_s0 + $0x40] sm:$0xff] }
 0xc4a   :  { %1777 = vmatmul.msk.f32.gmra.mxu0 %vm88_vm0, %v64_v34 }
 0xc4b   :  { %579 = vrot.lane.b32.xlu2 %v576_v35, %s2017_s24  ;;  %v577_v38 = vmul.f32 %v576_v35, %v538_v18 }
 0xca5   :  { %v580_v36 = vpop.permute.xlu2 %579 }
 0xca6   :  { %v582_v37 = vmul.f32 %v580_v36, %v576_v35 }
 0xca8   :  { %584 = vrot.lane.b32.xlu0 %v582_v37, %s2018_s8 }
 0xcc7   :  { %v211_v36 = vpop.f32.mrf.mxu0 }
 0xcc8   :  { %v212_v37 = vadd.f32 %v2164_v22, %v211_v36 }
 0xd1a   :  { %v585_v39 = vpop.permute.xlu0 %584 }
 0xd1b   :  { %v587_v40 = vadd.f32 %v585_v39, %v577_v38 }
 0xd1d   :  { %1863 = vtanh.f32 %v587_v40 }
 0xd23   :  { %v1864_v41 = vpop.eup %1863 }
 0xd24   :  { %590 = vrot.lane.b32.xlu1 %v1864_v41, %s2017_s24 }
 0xd96   :  { %v591_v43 = vpop.permute.xlu1 %590 }
 0xd97   :  { %v593_v44 = vmul.f32 %v591_v43, %v576_v35 }
 0xd99   :  { %597 = vrot.lane.b32.xlu2 %v593_v44, %s2018_s8 }
 0xdf3   :  { %v598_v45 = vpop.permute.xlu2 %597 }
 0xdf4   :  { %1801 = vmatmul.msk.f32.vlgmr.msrb.gmra.mxu1 %vm303_vm4, %v598_v45 }
 0xdf5   :  { %907 = vmatpush.msrb.mxu1 %v2087_v2 }
 0xdf7   :  { %908 = vmatpush.msrb.mxu1 %v2093_v3 }
 0xdf9   :  { %909 = vmatpush.msrb.mxu1 %v2099_v4 }
 0xdfb   :  { %910 = vmatpush.msrb.mxu1 %v2107_v5 }
 0xe71   :  { %v618_v51 = vpop.f32.mrf.mxu1 }
 0xe72   :  { %v621_v52 = vadd.f32 %v618_v51, %v206_v50 }
 0xe74   :  { %v622_v53 = vmul.f32 %v621_v52, %v2167_v25 }
 0xe76   :  { %1865 = vtanh.f32 %v622_v53  ;;  %v65_v53 = vld [vmem:[%s2699_s0 + $0x48] sm:$0xff] }
 0xe77   :  { %1778 = vmatmul.msk.f32.gmra.mxu0 %vm88_vm0, %v65_v53 }
 0xe7c   :  { %v1866_v54 = vpop.eup %1865 }
 0xe7d   :  { %v624_v55 = vmul.f32 %v1866_v54, %v2167_v25 }
 0xe7f   :  { %v625_v56 = vadd.f32 %v624_v55, %v2170_v30 }
 0xe81   :  { %628 = vrot.lane.b32.xlu0 %v625_v56, %s2017_s24  ;;  %v626_v59 = vmul.f32 %v625_v56, %v587_v40 }
 0xef3   :  { %v629_v57 = vpop.permute.xlu0 %628 }
 0xef4   :  { %v631_v58 = vmul.f32 %v629_v57, %v625_v56  ;;  %v214_v57 = vpop.f32.mrf.mxu0 }
 0xef6   :  { %633 = vrot.lane.b32.xlu1 %v631_v58, %s2018_s8  ;;  %v215_v58 = vadd.f32 %v2164_v22, %v214_v57 }
 0xf68   :  { %v634_v60 = vpop.permute.xlu1 %633 }
 0xf69   :  { %v636_v61 = vadd.f32 %v634_v60, %v626_v59 }
 0xf6b   :  { %1867 = vtanh.f32 %v636_v61 }
 0xf71   :  { %v1868_v62 = vpop.eup %1867 }
 0xf72   :  { %639 = vrot.lane.b32.xlu2 %v1868_v62, %s2017_s24 }
 0xfcc   :  { %v640_v63 = vpop.permute.xlu2 %639 }
 0xfcd   :  { %v642_v0 = vmul.f32 %v640_v63, %v625_v56 }
 0xfcf   :  { %646 = vrot.lane.b32.xlu0 %v642_v0, %s2018_s8 }
0x1041   :  { %v647_v6 = vpop.permute.xlu0 %646 }
0x1042   :  { %1802 = vmatmul.msk.f32.vlgmr.msrb.gmra.mxu2 %vm303_vm4, %v647_v6 }
0x1043   :  { %956 = vmatpush.msrb.mxu2 %v2087_v2 }
0x1045   :  { %957 = vmatpush.msrb.mxu2 %v2093_v3 }
0x1047   :  { %958 = vmatpush.msrb.mxu2 %v2099_v4 }
0x1049   :  { %959 = vmatpush.msrb.mxu2 %v2107_v5 }
0x10c5   :  { %v667_v11 = vpop.f32.mrf.mxu2 }
0x10c6   :  { %v670_v12 = vadd.f32 %v667_v11, %v209_v8 }
0x10c8   :  { %v671_v18 = vmul.f32 %v670_v12, %v2167_v25 }
0x10ca   :  { %1869 = vtanh.f32 %v671_v18 }
0x10d0   :  { %v1870_v19 = vpop.eup %1869 }
0x10d1   :  { %v673_v21 = vmul.f32 %v1870_v19, %v2167_v25 }
0x10d3   :  { %v674_v23 = vadd.f32 %v673_v21, %v2170_v30  ;;  %v66_v21 = vld [vmem:[%s2699_s0 + $0x50] sm:$0xff] }
0x10d4   :  { %1779 = vmatmul.msk.f32.gmra.mxu0 %vm88_vm0, %v66_v21 }
0x10d5   :  { %677 = vrot.lane.b32.xlu1 %v674_v23, %s2017_s24  ;;  %v675_v27 = vmul.f32 %v674_v23, %v636_v61 }
0x1147   :  { %v678_v24 = vpop.permute.xlu1 %677 }
0x1148   :  { %v680_v26 = vmul.f32 %v678_v24, %v674_v23 }
0x114a   :  { %682 = vrot.lane.b32.xlu2 %v680_v26, %s2018_s8 }
0x1151   :  { %v217_v24 = vpop.f32.mrf.mxu0 }
0x1152   :  { %v218_v26 = vadd.f32 %v2164_v22, %v217_v24 }
0x11a4   :  { %v683_v28 = vpop.permute.xlu2 %682 }
0x11a5   :  { %v685_v29 = vadd.f32 %v683_v28, %v675_v27 }
0x11a7   :  { %1871 = vtanh.f32 %v685_v29 }
0x11ad   :  { %v1872_v31 = vpop.eup %1871 }
0x11ae   :  { %688 = vrot.lane.b32.xlu0 %v1872_v31, %s2017_s24 }
0x1220   :  { %v689_v32 = vpop.permute.xlu0 %688 }
0x1221   :  { %v691_v33 = vmul.f32 %v689_v32, %v674_v23 }
0x1223   :  { %695 = vrot.lane.b32.xlu1 %v691_v33, %s2018_s8 }
0x1295   :  { %v696_v35 = vpop.permute.xlu1 %695 }
0x1296   :  { %1803 = vmatmul.msk.f32.vlgmr.msrb.gmra.mxu3 %vm303_vm4, %v696_v35 }
0x1297   :  { %1005 = vmatpush.msrb.mxu3 %v2087_v2 }
0x1299   :  { %1006 = vmatpush.msrb.mxu3 %v2093_v3 }
0x129b   :  { %1007 = vmatpush.msrb.mxu3 %v2099_v4 }
0x129d   :  { %1008 = vmatpush.msrb.mxu3 %v2107_v5 }
0x1319   :  { %v716_v38 = vpop.f32.mrf.mxu3 }
0x131a   :  { %v719_v39 = vadd.f32 %v716_v38, %v212_v37 }
0x131c   :  { %v720_v40 = vmul.f32 %v719_v39, %v2167_v25 }
0x131e   :  { %1873 = vtanh.f32 %v720_v40 }
0x1324   :  { %v1874_v41 = vpop.eup %1873 }
0x1325   :  { %v722_v42 = vmul.f32 %v1874_v41, %v2167_v25 }
0x1327   :  { %v723_v43 = vadd.f32 %v722_v42, %v2170_v30  ;;  %v67_v42 = vld [vmem:[%s2699_s0 + $0x58] sm:$0xff] }
0x1328   :  { %1780 = vmatmul.msk.f32.gmra.mxu0 %vm88_vm0, %v67_v42 }
0x1329   :  { %726 = vrot.lane.b32.xlu2 %v723_v43, %s2017_s24  ;;  %v724_v49 = vmul.f32 %v723_v43, %v685_v29 }
0x1383   :  { %v727_v44 = vpop.permute.xlu2 %726 }
0x1384   :  { %v729_v45 = vmul.f32 %v727_v44, %v723_v43 }
0x1386   :  { %731 = vrot.lane.b32.xlu0 %v729_v45, %s2018_s8 }
0x13a5   :  { %v220_v44 = vpop.f32.mrf.mxu0 }
0x13a6   :  { %v221_v45 = vadd.f32 %v2164_v22, %v220_v44 }
0x13f8   :  { %v732_v50 = vpop.permute.xlu0 %731 }
0x13f9   :  { %v734_v51 = vadd.f32 %v732_v50, %v724_v49 }
0x13fb   :  { %1875 = vtanh.f32 %v734_v51 }
0x1401   :  { %v1876_v52 = vpop.eup %1875 }
0x1402   :  { %737 = vrot.lane.b32.xlu1 %v1876_v52, %s2017_s24 }
0x1474   :  { %v738_v54 = vpop.permute.xlu1 %737 }
0x1475   :  { %v740_v55 = vmul.f32 %v738_v54, %v723_v43 }
0x1477   :  { %744 = vrot.lane.b32.xlu2 %v740_v55, %s2018_s8 }
0x14d1   :  { %v745_v56 = vpop.permute.xlu2 %744 }
0x14d2   :  { %1804 = vmatmul.msk.f32.vlgmr.msra.gmra.mxu1 %vm303_vm4, %v745_v56 }
0x14d3   :  { %1054 = vmatpush.msra.mxu1 %v2087_v2 }
0x14d5   :  { %1055 = vmatpush.msra.mxu1 %v2093_v3 }
0x14d7   :  { %1056 = vmatpush.msra.mxu1 %v2099_v4 }
0x14d9   :  { %1057 = vmatpush.msra.mxu1 %v2107_v5 }
0x154f   :  { %v765_v59 = vpop.f32.mrf.mxu1 }
0x1550   :  { %v768_v60 = vadd.f32 %v765_v59, %v215_v58 }
0x1552   :  { %v769_v61 = vmul.f32 %v768_v60, %v2167_v25 }
0x1554   :  { %1877 = vtanh.f32 %v769_v61  ;;  %v68_v61 = vld [vmem:[%s2699_s0 + $0x60] sm:$0xff] }
0x1555   :  { %1781 = vmatmul.msk.f32.gmra.mxu0 %vm88_vm0, %v68_v61 }
0x155a   :  { %v1878_v62 = vpop.eup %1877 }
0x155b   :  { %v771_v63 = vmul.f32 %v1878_v62, %v2167_v25 }
0x155d   :  { %v772_v0 = vadd.f32 %v771_v63, %v2170_v30 }
0x155f   :  { %775 = vrot.lane.b32.xlu0 %v772_v0, %s2017_s24  ;;  %v773_v7 = vmul.f32 %v772_v0, %v734_v51 }
0x15d1   :  { %v776_v1 = vpop.permute.xlu0 %775 }
0x15d2   :  { %v778_v6 = vmul.f32 %v776_v1, %v772_v0  ;;  %v223_v1 = vpop.f32.mrf.mxu0 }
0x15d4   :  { %780 = vrot.lane.b32.xlu1 %v778_v6, %s2018_s8  ;;  %v224_v6 = vadd.f32 %v2164_v22, %v223_v1  ;;  %v71_v1 = vld [vmem:[%s2699_s0 + $0x78] sm:$0xff] }
0x1646   :  { %v781_v8 = vpop.permute.xlu1 %780 }
0x1647   :  { %v783_v11 = vadd.f32 %v781_v8, %v773_v7 }
0x1649   :  { %1879 = vtanh.f32 %v783_v11 }
0x164f   :  { %v1880_v12 = vpop.eup %1879 }
0x1650   :  { %786 = vrot.lane.b32.xlu2 %v1880_v12, %s2017_s24 }
0x16aa   :  { %v787_v18 = vpop.permute.xlu2 %786 }
0x16ab   :  { %v789_v19 = vmul.f32 %v787_v18, %v772_v0 }
0x16ad   :  { %793 = vrot.lane.b32.xlu0 %v789_v19, %s2018_s8 }
0x171f   :  { %v794_v23 = vpop.permute.xlu0 %793 }
0x1720   :  { %1805 = vmatmul.msk.f32.vlgmr.msra.gmra.mxu2 %vm303_vm4, %v794_v23 }
0x1721   :  { %1103 = vmatpush.msra.mxu2 %v2087_v2 }
0x1723   :  { %1104 = vmatpush.msra.mxu2 %v2093_v3 }
0x1725   :  { %1105 = vmatpush.msra.mxu2 %v2099_v4 }
0x1727   :  { %1106 = vmatpush.msra.mxu2 %v2107_v5 }
0x17a3   :  { %v814_v27 = vpop.f32.mrf.mxu2 }
0x17a4   :  { %v817_v28 = vadd.f32 %v814_v27, %v218_v26 }
0x17a6   :  { %v818_v29 = vmul.f32 %v817_v28, %v2167_v25 }
0x17a8   :  { %1881 = vtanh.f32 %v818_v29 }
0x17ae   :  { %v1882_v31 = vpop.eup %1881 }
0x17af   :  { %v820_v32 = vmul.f32 %v1882_v31, %v2167_v25 }
0x17b1   :  { %v821_v33 = vadd.f32 %v820_v32, %v2170_v30  ;;  %v69_v32 = vld [vmem:[%s2699_s0 + $0x68] sm:$0xff] }
0x17b2   :  { %1782 = vmatmul.msk.f32.gmra.mxu0 %vm88_vm0, %v69_v32 }
0x17b3   :  { %824 = vrot.lane.b32.xlu1 %v821_v33, %s2017_s24  ;;  %v822_v36 = vmul.f32 %v821_v33, %v783_v11 }
0x1825   :  { %v825_v34 = vpop.permute.xlu1 %824 }
0x1826   :  { %v827_v35 = vmul.f32 %v825_v34, %v821_v33 }
0x1828   :  { %829 = vrot.lane.b32.xlu2 %v827_v35, %s2018_s8 }
0x182f   :  { %v226_v34 = vpop.f32.mrf.mxu0 }
0x1830   :  { %v227_v35 = vadd.f32 %v2164_v22, %v226_v34 }
0x1882   :  { %v830_v37 = vpop.permute.xlu2 %829 }
0x1883   :  { %v832_v38 = vadd.f32 %v830_v37, %v822_v36 }
0x1885   :  { %1883 = vtanh.f32 %v832_v38 }
0x188b   :  { %v1884_v39 = vpop.eup %1883 }
0x188c   :  { %835 = vrot.lane.b32.xlu0 %v1884_v39, %s2017_s24 }
0x18fe   :  { %v836_v40 = vpop.permute.xlu0 %835 }
0x18ff   :  { %v838_v41 = vmul.f32 %v836_v40, %v821_v33 }
0x1901   :  { %842 = vrot.lane.b32.xlu1 %v838_v41, %s2018_s8 }
0x1973   :  { %v843_v43 = vpop.permute.xlu1 %842 }
0x1974   :  { %1806 = vmatmul.msk.f32.vlgmr.msra.gmra.mxu3 %vm303_vm4, %v843_v43 }
0x1975   :  { %1152 = vmatpush.msra.mxu3 %v2087_v2 }
0x1977   :  { %1153 = vmatpush.msra.mxu3 %v2093_v3 }
0x1979   :  { %1154 = vmatpush.msra.mxu3 %v2099_v4 }
0x197b   :  { %1155 = vmatpush.msra.mxu3 %v2107_v5 }
0x19f7   :  { %v863_v49 = vpop.f32.mrf.mxu3 }
0x19f8   :  { %v866_v50 = vadd.f32 %v863_v49, %v221_v45 }
0x19fa   :  { %v867_v51 = vmul.f32 %v866_v50, %v2167_v25 }
0x19fc   :  { %1885 = vtanh.f32 %v867_v51 }
0x1a02   :  { %v1886_v52 = vpop.eup %1885 }
0x1a03   :  { %v869_v53 = vmul.f32 %v1886_v52, %v2167_v25 }
0x1a05   :  { %v870_v54 = vadd.f32 %v869_v53, %v2170_v30  ;;  %v70_v53 = vld [vmem:[%s2699_s0 + $0x70] sm:$0xff] }
0x1a06   :  { %1783 = vmatmul.msk.f32.gmra.mxu0 %vm88_vm0, %v70_v53 }
0x1a07   :  { %873 = vrot.lane.b32.xlu2 %v870_v54, %s2017_s24  ;;  %v871_v57 = vmul.f32 %v870_v54, %v832_v38 }
0x1a0e   :  { %1784 = vmatmul.msk.f32.gmra.mxu0 %vm88_vm0, %v71_v1 }
0x1a61   :  { %v874_v55 = vpop.permute.xlu2 %873 }
0x1a62   :  { %v876_v56 = vmul.f32 %v874_v55, %v870_v54 }
0x1a64   :  { %878 = vrot.lane.b32.xlu0 %v876_v56, %s2018_s8 }
0x1a83   :  { %v229_v55 = vpop.f32.mrf.mxu0 }
0x1a84   :  { %v230_v56 = vadd.f32 %v2164_v22, %v229_v55 }
0x1ad6   :  { %v879_v58 = vpop.permute.xlu0 %878 }
0x1ad7   :  { %v881_v59 = vadd.f32 %v879_v58, %v871_v57 }
0x1ad9   :  { %1887 = vtanh.f32 %v881_v59 }
0x1adf   :  { %v1888_v60 = vpop.eup %1887 }
0x1ae0   :  { %884 = vrot.lane.b32.xlu1 %v1888_v60, %s2017_s24 }
0x1b52   :  { %v885_v62 = vpop.permute.xlu1 %884 }
0x1b53   :  { %v887_v63 = vmul.f32 %v885_v62, %v870_v54 }
0x1b55   :  { %891 = vrot.lane.b32.xlu2 %v887_v63, %s2018_s8 }
0x1baf   :  { %v892_v0 = vpop.permute.xlu2 %891 }
0x1bb0   :  { %1807 = vmatmul.msk.f32.vlgmr.msrb.gmra.mxu1 %vm303_vm4, %v892_v0 }
0x1bb1   :  { %1201 = vmatpush.msrb.mxu1 %v2087_v2 }
0x1bb3   :  { %1202 = vmatpush.msrb.mxu1 %v2093_v3 }
0x1bb5   :  { %1203 = vmatpush.msrb.mxu1 %v2099_v4 }
0x1bb7   :  { %1204 = vmatpush.msrb.mxu1 %v2107_v5 }
0x1c2d   :  { %v912_v7 = vpop.f32.mrf.mxu1 }
0x1c2e   :  { %v915_v8 = vadd.f32 %v912_v7, %v224_v6 }
0x1c30   :  { %v916_v11 = vmul.f32 %v915_v8, %v2167_v25 }
0x1c32   :  { %1889 = vtanh.f32 %v916_v11  ;;  %v2462_v11 = vld [vmem:[%s2701_s2 + $0x18] sm:$0xff] }
0x1c38   :  { %v1890_v12 = vpop.eup %1889 }
0x1c39   :  { %v918_v18 = vmul.f32 %v1890_v12, %v2167_v25  ;;  %v2468_v12 = vld [vmem:[%s2701_s2 + $0x10] sm:$0xff] }
0x1c3b   :  { %v919_v19 = vadd.f32 %v918_v18, %v2170_v30  ;;  %v2474_v18 = vld [vmem:[%s2701_s2 + $0x8] sm:$0xff] }
0x1c3d   :  { %922 = vrot.lane.b32.xlu0 %v919_v19, %s2017_s24  ;;  %v920_v24 = vmul.f32 %v919_v19, %v881_v59 }
0x1caf   :  { %v923_v21 = vpop.permute.xlu0 %922 }
0x1cb0   :  { %v925_v23 = vmul.f32 %v923_v21, %v919_v19  ;;  %v232_v21 = vpop.f32.mrf.mxu0 }
0x1cb2   :  { %927 = vrot.lane.b32.xlu1 %v925_v23, %s2018_s8  ;;  %v233_v23 = vadd.f32 %v2164_v22, %v232_v21 }
0x1d24   :  { %v928_v26 = vpop.permute.xlu1 %927 }
0x1d25   :  { %v930_v27 = vadd.f32 %v928_v26, %v920_v24 }
0x1d27   :  { %1891 = vtanh.f32 %v930_v27 }
0x1d2d   :  { %v1892_v28 = vpop.eup %1891 }
0x1d2e   :  { %933 = vrot.lane.b32.xlu2 %v1892_v28, %s2017_s24 }
0x1d88   :  { %v934_v29 = vpop.permute.xlu2 %933 }
0x1d89   :  { %v936_v31 = vmul.f32 %v934_v29, %v919_v19  ;;  %v2480_v19 = vld [vmem:[%s2701_s2] sm:$0xff] }
0x1d8b   :  { %940 = vrot.lane.b32.xlu0 %v936_v31, %s2018_s8 }
0x1dfd   :  { %v941_v33 = vpop.permute.xlu0 %940 }
0x1dfe   :  { %1808 = vmatmul.msk.f32.vlgmr.msrb.gmra.mxu2 %vm303_vm4, %v941_v33 }
0x1dff   :  { %1250 = vmatpush.msrb.mxu2 %v2087_v2 }
0x1e01   :  { %1251 = vmatpush.msrb.mxu2 %v2093_v3 }
0x1e03   :  { %1252 = vmatpush.msrb.mxu2 %v2099_v4 }
0x1e05   :  { %1253 = vmatpush.msrb.mxu2 %v2107_v5 }
0x1e81   :  { %v961_v36 = vpop.f32.mrf.mxu2 }
0x1e82   :  { %v964_v37 = vadd.f32 %v961_v36, %v227_v35 }
0x1e84   :  { %v965_v38 = vmul.f32 %v964_v37, %v2167_v25 }
0x1e86   :  { %1893 = vtanh.f32 %v965_v38 }
0x1e8c   :  { %v1894_v39 = vpop.eup %1893 }
0x1e8d   :  { %v967_v40 = vmul.f32 %v1894_v39, %v2167_v25 }
0x1e8f   :  { %v968_v41 = vadd.f32 %v967_v40, %v2170_v30 }
0x1e91   :  { %971 = vrot.lane.b32.xlu1 %v968_v41, %s2017_s24  ;;  %v969_v44 = vmul.f32 %v968_v41, %v930_v27 }
0x1f03   :  { %v972_v42 = vpop.permute.xlu1 %971 }
0x1f04   :  { %v974_v43 = vmul.f32 %v972_v42, %v968_v41 }
0x1f06   :  { %976 = vrot.lane.b32.xlu2 %v974_v43, %s2018_s8 }
0x1f60   :  { %v977_v45 = vpop.permute.xlu2 %976 }
0x1f61   :  { %v979_v49 = vadd.f32 %v977_v45, %v969_v44 }
0x1f63   :  { %1895 = vtanh.f32 %v979_v49 }
0x1f69   :  { %v1896_v50 = vpop.eup %1895 }
0x1f6a   :  { %982 = vrot.lane.b32.xlu0 %v1896_v50, %s2017_s24 }
0x1fdc   :  { %v983_v51 = vpop.permute.xlu0 %982 }
0x1fdd   :  { %v985_v52 = vmul.f32 %v983_v51, %v968_v41  ;;  %v236_v41 = vadd.f32 %v2164_v22, %v2149_v13 }
0x1fdf   :  { %989 = vrot.lane.b32.xlu1 %v985_v52, %s2018_s8 }
0x2051   :  { %v990_v54 = vpop.permute.xlu1 %989 }
0x2052   :  { %1809 = vmatmul.msk.f32.vlgmr.msrb.gmra.mxu3 %vm303_vm4, %v990_v54 }
0x2053   :  { %1299 = vmatpush.msrb.mxu3 %v2087_v2 }
0x2055   :  { %1300 = vmatpush.msrb.mxu3 %v2093_v3 }
0x2057   :  { %1301 = vmatpush.msrb.mxu3 %v2099_v4 }
0x2059   :  { %1302 = vmatpush.msrb.mxu3 %v2107_v5 }
0x20d5   :  { %v1010_v57 = vpop.f32.mrf.mxu3 }
0x20d6   :  { %v1013_v58 = vadd.f32 %v1010_v57, %v230_v56 }
0x20d8   :  { %v1014_v59 = vmul.f32 %v1013_v58, %v2167_v25  ;;  %v2513_v58 = vld [vmem:[%s2702_s3] ss:$0 sm:$0xff] }
0x20da   :  { %1897 = vtanh.f32 %v1014_v59  ;;  %v239_v59 = vadd.f32 %v2513_v58, %v2151_v14 }
0x20e0   :  { %v1898_v60 = vpop.eup %1897 }
0x20e1   :  { %v1016_v61 = vmul.f32 %v1898_v60, %v2167_v25 }
0x20e3   :  { %v1017_v62 = vadd.f32 %v1016_v61, %v2170_v30 }
0x20e5   :  { %1020 = vrot.lane.b32.xlu2 %v1017_v62, %s2017_s24  ;;  %v1018_v4 = vmul.f32 %v1017_v62, %v979_v49 }
0x213f   :  { %v1021_v2 = vpop.permute.xlu2 %1020 }
0x2140   :  { %v1023_v3 = vmul.f32 %v1021_v2, %v1017_v62 }
0x2142   :  { %1025 = vrot.lane.b32.xlu0 %v1023_v3, %s2018_s8 }
0x21b4   :  { %v1026_v5 = vpop.permute.xlu0 %1025 }
0x21b5   :  { %v1028_v63 = vadd.f32 %v1026_v5, %v1018_v4 }
0x21b7   :  { %1899 = vtanh.f32 %v1028_v63 }
0x21bd   :  { %v1900_v0 = vpop.eup %1899 }
0x21be   :  { %1031 = vrot.lane.b32.xlu1 %v1900_v0, %s2017_s24 }
0x2230   :  { %v1032_v6 = vpop.permute.xlu1 %1031 }
0x2231   :  { %v1034_v7 = vmul.f32 %v1032_v6, %v1017_v62 }
0x2233   :  { %1038 = vrot.lane.b32.xlu2 %v1034_v7, %s2018_s8 }
0x228d   :  { %v1039_v8 = vpop.permute.xlu2 %1038 }
0x228e   :  { %1810 = vmatmul.msk.f32.vlgmr.msra.gmra.mxu1 %vm303_vm4, %v1039_v8 }
0x228f   :  { %1348 = vmatpush.msra.mxu1 %v2462_v11 }
0x2291   :  { %1349 = vmatpush.msra.mxu1 %v2468_v12 }
0x2293   :  { %1350 = vmatpush.msra.mxu1 %v2474_v18 }
0x2295   :  { %1351 = vmatpush.msra.mxu1 %v2480_v19 }
0x230b   :  { %v1059_v24 = vpop.f32.mrf.mxu1 }
0x230c   :  { %v1062_v26 = vadd.f32 %v1059_v24, %v233_v23  ;;  %v242_v23 = vadd.f32 %v2513_v58, %v2153_v15 }
0x230e   :  { %v1063_v27 = vmul.f32 %v1062_v26, %v2167_v25 }
0x2310   :  { %1901 = vtanh.f32 %v1063_v27 }
0x2316   :  { %v1902_v28 = vpop.eup %1901 }
0x2317   :  { %v1065_v29 = vmul.f32 %v1902_v28, %v2167_v25 }
0x2319   :  { %v1066_v31 = vadd.f32 %v1065_v29, %v2170_v30 }
0x231b   :  { %1069 = vrot.lane.b32.xlu0 %v1066_v31, %s2017_s24  ;;  %v1067_v34 = vmul.f32 %v1066_v31, %v1028_v63 }
0x238d   :  { %v1070_v32 = vpop.permute.xlu0 %1069 }
0x238e   :  { %v1072_v33 = vmul.f32 %v1070_v32, %v1066_v31 }
0x2390   :  { %1074 = vrot.lane.b32.xlu1 %v1072_v33, %s2018_s8 }
0x2402   :  { %v1075_v35 = vpop.permute.xlu1 %1074 }
0x2403   :  { %v1077_v36 = vadd.f32 %v1075_v35, %v1067_v34 }
0x2405   :  { %1903 = vtanh.f32 %v1077_v36 }
0x240b   :  { %v1904_v37 = vpop.eup %1903 }
0x240c   :  { %1080 = vrot.lane.b32.xlu2 %v1904_v37, %s2017_s24 }
0x2466   :  { %v1081_v38 = vpop.permute.xlu2 %1080 }
0x2467   :  { %v1083_v39 = vmul.f32 %v1081_v38, %v1066_v31 }
0x2469   :  { %1087 = vrot.lane.b32.xlu0 %v1083_v39, %s2018_s8 }
0x24db   :  { %v1088_v40 = vpop.permute.xlu0 %1087 }
0x24dc   :  { %1811 = vmatmul.msk.f32.vlgmr.msra.gmra.mxu2 %vm303_vm4, %v1088_v40  ;;  %v245_v40 = vadd.f32 %v2513_v58, %v2155_v16 }
0x24dd   :  { %1397 = vmatpush.msra.mxu2 %v2462_v11 }
0x24df   :  { %1398 = vmatpush.msra.mxu2 %v2468_v12 }
0x24e1   :  { %1399 = vmatpush.msra.mxu2 %v2474_v18 }
0x24e3   :  { %1400 = vmatpush.msra.mxu2 %v2480_v19 }
0x255f   :  { %v1108_v42 = vpop.f32.mrf.mxu2 }
0x2560   :  { %v1111_v43 = vadd.f32 %v1108_v42, %v236_v41 }
0x2562   :  { %v1112_v44 = vmul.f32 %v1111_v43, %v2167_v25 }
0x2564   :  { %1905 = vtanh.f32 %v1112_v44 }
0x256a   :  { %v1906_v45 = vpop.eup %1905 }
0x256b   :  { %v1114_v49 = vmul.f32 %v1906_v45, %v2167_v25 }
0x256d   :  { %v1115_v50 = vadd.f32 %v1114_v49, %v2170_v30 }
0x256f   :  { %1118 = vrot.lane.b32.xlu1 %v1115_v50, %s2017_s24  ;;  %v1116_v53 = vmul.f32 %v1115_v50, %v1077_v36 }
0x25e1   :  { %v1119_v51 = vpop.permute.xlu1 %1118 }
0x25e2   :  { %v1121_v52 = vmul.f32 %v1119_v51, %v1115_v50 }
0x25e4   :  { %1123 = vrot.lane.b32.xlu2 %v1121_v52, %s2018_s8 }
0x263e   :  { %v1124_v54 = vpop.permute.xlu2 %1123 }
0x263f   :  { %v1126_v55 = vadd.f32 %v1124_v54, %v1116_v53 }
0x2641   :  { %1907 = vtanh.f32 %v1126_v55 }
0x2647   :  { %v1908_v13 = vpop.eup %1907 }
0x2648   :  { %1129 = vrot.lane.b32.xlu0 %v1908_v13, %s2017_s24 }
0x26ba   :  { %v1130_v22 = vpop.permute.xlu0 %1129 }
0x26bb   :  { %v1132_v56 = vmul.f32 %v1130_v22, %v1115_v50 }
0x26bd   :  { %1136 = vrot.lane.b32.xlu1 %v1132_v56, %s2018_s8  ;;  %v248_v56 = vadd.f32 %v2513_v58, %v2157_v17 }
0x272f   :  { %v1137_v57 = vpop.permute.xlu1 %1136 }
0x2730   :  { %1812 = vmatmul.msk.f32.vlgmr.msra.gmra.mxu3 %vm303_vm4, %v1137_v57 }
0x2731   :  { %1446 = vmatpush.msra.mxu3 %v2462_v11 }
0x2733   :  { %1447 = vmatpush.msra.mxu3 %v2468_v12 }
0x2735   :  { %1448 = vmatpush.msra.mxu3 %v2474_v18 }
0x2737   :  { %1449 = vmatpush.msra.mxu3 %v2480_v19 }
0x27b3   :  { %v1157_v60 = vpop.f32.mrf.mxu3 }
0x27b4   :  { %v1160_v61 = vadd.f32 %v1157_v60, %v239_v59 }
0x27b6   :  { %v1161_v62 = vmul.f32 %v1160_v61, %v2167_v25 }
0x27b8   :  { %1909 = vtanh.f32 %v1161_v62 }
0x27be   :  { %v1910_v2 = vpop.eup %1909 }
0x27bf   :  { %v1163_v3 = vmul.f32 %v1910_v2, %v2167_v25 }
0x27c1   :  { %v1164_v4 = vadd.f32 %v1163_v3, %v2170_v30 }
0x27c3   :  { %1167 = vrot.lane.b32.xlu2 %v1164_v4, %s2017_s24  ;;  %v1165_v0 = vmul.f32 %v1164_v4, %v1126_v55 }
0x281d   :  { %v1168_v5 = vpop.permute.xlu2 %1167 }
0x281e   :  { %v1170_v63 = vmul.f32 %v1168_v5, %v1164_v4 }
0x2820   :  { %1172 = vrot.lane.b32.xlu0 %v1170_v63, %s2018_s8 }
0x2892   :  { %v1173_v1 = vpop.permute.xlu0 %1172 }
0x2893   :  { %v1175_v6 = vadd.f32 %v1173_v1, %v1165_v0  ;;  %v251_v0 = vadd.f32 %v2513_v58, %v2159_v20 }
0x2895   :  { %1911 = vtanh.f32 %v1175_v6 }
0x289b   :  { %v1912_v14 = vpop.eup %1911 }
0x289c   :  { %1178 = vrot.lane.b32.xlu1 %v1912_v14, %s2017_s24 }
0x290e   :  { %v1179_v7 = vpop.permute.xlu1 %1178 }
0x290f   :  { %v1181_v8 = vmul.f32 %v1179_v7, %v1164_v4 }
0x2911   :  { %1185 = vrot.lane.b32.xlu2 %v1181_v8, %s2018_s8 }
0x296b   :  { %v1186_v21 = vpop.permute.xlu2 %1185 }
0x296c   :  { %1813 = vmatmul.msk.f32.vlgmr.msrb.gmra.mxu1 %vm303_vm4, %v1186_v21 }
0x296d   :  { %1495 = vmatpush.msrb.mxu1 %v2462_v11 }
0x296f   :  { %1496 = vmatpush.msrb.mxu1 %v2468_v12 }
0x2971   :  { %1497 = vmatpush.msrb.mxu1 %v2474_v18 }
0x2973   :  { %1498 = vmatpush.msrb.mxu1 %v2480_v19 }
0x29e9   :  { %v1206_v24 = vpop.f32.mrf.mxu1 }
0x29ea   :  { %v1209_v26 = vadd.f32 %v1206_v24, %v242_v23 }
0x29ec   :  { %v1210_v27 = vmul.f32 %v1209_v26, %v2167_v25 }
0x29ee   :  { %1913 = vtanh.f32 %v1210_v27 }
0x29f4   :  { %v1914_v28 = vpop.eup %1913 }
0x29f5   :  { %v1212_v29 = vmul.f32 %v1914_v28, %v2167_v25 }
0x29f7   :  { %v1213_v31 = vadd.f32 %v1212_v29, %v2170_v30 }
0x29f9   :  { %1216 = vrot.lane.b32.xlu0 %v1213_v31, %s2017_s24  ;;  %v1214_v34 = vmul.f32 %v1213_v31, %v1175_v6 }
0x2a6b   :  { %v1217_v32 = vpop.permute.xlu0 %1216 }
0x2a6c   :  { %v1219_v33 = vmul.f32 %v1217_v32, %v1213_v31 }
0x2a6e   :  { %1221 = vrot.lane.b32.xlu1 %v1219_v33, %s2018_s8  ;;  %v254_v33 = vadd.f32 %v2513_v58, %v2203_v46 }
0x2ae0   :  { %v1222_v35 = vpop.permute.xlu1 %1221 }
0x2ae1   :  { %v1224_v36 = vadd.f32 %v1222_v35, %v1214_v34 }
0x2ae3   :  { %1915 = vtanh.f32 %v1224_v36 }
0x2ae9   :  { %v1916_v15 = vpop.eup %1915 }
0x2aea   :  { %1227 = vrot.lane.b32.xlu2 %v1916_v15, %s2017_s24 }
0x2b44   :  { %v1228_v37 = vpop.permute.xlu2 %1227 }
0x2b45   :  { %v1230_v38 = vmul.f32 %v1228_v37, %v1213_v31 }
0x2b47   :  { %1234 = vrot.lane.b32.xlu0 %v1230_v38, %s2018_s8 }
0x2bb9   :  { %v1235_v39 = vpop.permute.xlu0 %1234 }
0x2bba   :  { %1814 = vmatmul.msk.f32.vlgmr.msrb.gmra.mxu2 %vm303_vm4, %v1235_v39 }
0x2bbb   :  { %1544 = vmatpush.msrb.mxu2 %v2462_v11 }
0x2bbd   :  { %1545 = vmatpush.msrb.mxu2 %v2468_v12 }
0x2bbf   :  { %1546 = vmatpush.msrb.mxu2 %v2474_v18 }
0x2bc1   :  { %1547 = vmatpush.msrb.mxu2 %v2480_v19 }
0x2c3d   :  { %v1255_v41 = vpop.f32.mrf.mxu2 }
0x2c3e   :  { %v1258_v42 = vadd.f32 %v1255_v41, %v245_v40 }
0x2c40   :  { %v1259_v43 = vmul.f32 %v1258_v42, %v2167_v25 }
0x2c42   :  { %1917 = vtanh.f32 %v1259_v43 }
0x2c48   :  { %v1918_v44 = vpop.eup %1917 }
0x2c49   :  { %v1261_v45 = vmul.f32 %v1918_v44, %v2167_v25 }
0x2c4b   :  { %v1262_v49 = vadd.f32 %v1261_v45, %v2170_v30 }
0x2c4d   :  { %1265 = vrot.lane.b32.xlu1 %v1262_v49, %s2017_s24  ;;  %v1263_v52 = vmul.f32 %v1262_v49, %v1224_v36 }
0x2cbf   :  { %v1266_v50 = vpop.permute.xlu1 %1265 }
0x2cc0   :  { %v1268_v51 = vmul.f32 %v1266_v50, %v1262_v49  ;;  %v257_v50 = vadd.f32 %v2513_v58, %v2205_v47 }
0x2cc2   :  { %1270 = vrot.lane.b32.xlu2 %v1268_v51, %s2018_s8 }
0x2d1c   :  { %v1271_v53 = vpop.permute.xlu2 %1270 }
0x2d1d   :  { %v1273_v54 = vadd.f32 %v1271_v53, %v1263_v52 }
0x2d1f   :  { %1919 = vtanh.f32 %v1273_v54 }
0x2d25   :  { %v1920_v16 = vpop.eup %1919 }
0x2d26   :  { %1276 = vrot.lane.b32.xlu0 %v1920_v16, %s2017_s24 }
0x2d98   :  { %v1277_v55 = vpop.permute.xlu0 %1276 }
0x2d99   :  { %v1279_v13 = vmul.f32 %v1277_v55, %v1262_v49 }
0x2d9b   :  { %1283 = vrot.lane.b32.xlu1 %v1279_v13, %s2018_s8 }
0x2e0d   :  { %v1284_v22 = vpop.permute.xlu1 %1283 }
0x2e0e   :  { %1815 = vmatmul.msk.f32.vlgmr.msrb.gmra.mxu3 %vm303_vm4, %v1284_v22 }
0x2e0f   :  { %1593 = vmatpush.msrb.mxu3 %v2462_v11 }
0x2e11   :  { %1594 = vmatpush.msrb.mxu3 %v2468_v12 }
0x2e13   :  { %1595 = vmatpush.msrb.mxu3 %v2474_v18 }
0x2e15   :  { %1596 = vmatpush.msrb.mxu3 %v2480_v19 }
0x2e91   :  { %v1304_v57 = vpop.f32.mrf.mxu3 }
0x2e92   :  { %v1307_v59 = vadd.f32 %v1304_v57, %v248_v56 }
0x2e94   :  { %v1308_v60 = vmul.f32 %v1307_v59, %v2167_v25 }
0x2e96   :  { %1921 = vtanh.f32 %v1308_v60 }
0x2e9c   :  { %v1922_v61 = vpop.eup %1921 }
0x2e9d   :  { %v1310_v62 = vmul.f32 %v1922_v61, %v2167_v25 }
0x2e9f   :  { %v1311_v2 = vadd.f32 %v1310_v62, %v2170_v30 }
0x2ea1   :  { %1314 = vrot.lane.b32.xlu2 %v1311_v2, %s2017_s24  ;;  %v1312_v18 = vmul.f32 %v1311_v2, %v1273_v54 }
0x2efb   :  { %v1315_v11 = vpop.permute.xlu2 %1314 }
0x2efc   :  { %v1317_v12 = vmul.f32 %v1315_v11, %v1311_v2 }
0x2efe   :  { %1319 = vrot.lane.b32.xlu0 %v1317_v12, %s2018_s8 }
0x2f70   :  { %v1320_v19 = vpop.permute.xlu0 %1319 }
0x2f71   :  { %v1322_v3 = vadd.f32 %v1320_v19, %v1312_v18 }
0x2f73   :  { %1923 = vtanh.f32 %v1322_v3 }
0x2f79   :  { %v1924_v17 = vpop.eup %1923 }
0x2f7a   :  { %1325 = vrot.lane.b32.xlu1 %v1924_v17, %s2017_s24 }
0x2fec   :  { %v1326_v4 = vpop.permute.xlu1 %1325 }
0x2fed   :  { %v1328_v5 = vmul.f32 %v1326_v4, %v1311_v2  ;;  %v260_v2 = vadd.f32 %v2513_v58, %v2207_v48 }
0x2fef   :  { %1332 = vrot.lane.b32.xlu2 %v1328_v5, %s2018_s8 }
0x3049   :  { %v1333_v63 = vpop.permute.xlu2 %1332 }
0x304a   :  { %1816 = vmatmul.msk.f32.vlgmr.msra.gmra.mxu1 %vm303_vm4, %v1333_v63 }
0x30c7   :  { %v1353_v1 = vpop.f32.mrf.mxu1 }
0x30c8   :  { %v1356_v6 = vadd.f32 %v1353_v1, %v251_v0 }
0x30ca   :  { %v1357_v14 = vmul.f32 %v1356_v6, %v2167_v25 }
0x30cc   :  { %1925 = vtanh.f32 %v1357_v14 }
0x30d2   :  { %v1926_v7 = vpop.eup %1925 }
0x30d3   :  { %v1359_v8 = vmul.f32 %v1926_v7, %v2167_v25 }
0x30d5   :  { %v1360_v21 = vadd.f32 %v1359_v8, %v2170_v30  ;;  %v263_v8 = vadd.f32 %v2513_v58, %v2238_v9 }
0x30d7   :  { %1363 = vrot.lane.b32.xlu0 %v1360_v21, %s2017_s24  ;;  %v1361_v26 = vmul.f32 %v1360_v21, %v1322_v3 }
0x3149   :  { %v1364_v23 = vpop.permute.xlu0 %1363 }
0x314a   :  { %v1366_v24 = vmul.f32 %v1364_v23, %v1360_v21 }
0x314c   :  { %1368 = vrot.lane.b32.xlu1 %v1366_v24, %s2018_s8 }
0x31be   :  { %v1369_v27 = vpop.permute.xlu1 %1368 }
0x31bf   :  { %v1371_v28 = vadd.f32 %v1369_v27, %v1361_v26 }
0x31c1   :  { %1927 = vtanh.f32 %v1371_v28 }
0x31c7   :  { %v1928_v20 = vpop.eup %1927 }
0x31c8   :  { %1374 = vrot.lane.b32.xlu2 %v1928_v20, %s2017_s24 }
0x3222   :  { %v1375_v29 = vpop.permute.xlu2 %1374 }
0x3223   :  { %v1377_v31 = vmul.f32 %v1375_v29, %v1360_v21 }
0x3225   :  { %1381 = vrot.lane.b32.xlu0 %v1377_v31, %s2018_s8 }
0x3297   :  { %v1382_v32 = vpop.permute.xlu0 %1381 }
0x3298   :  { %1817 = vmatmul.msk.f32.vlgmr.msra.gmra.mxu2 %vm303_vm4, %v1382_v32 }
0x331b   :  { %v1402_v34 = vpop.f32.mrf.mxu2 }
0x331c   :  { %v1405_v35 = vadd.f32 %v1402_v34, %v254_v33 }
0x331e   :  { %v1406_v36 = vmul.f32 %v1405_v35, %v2167_v25 }
0x3320   :  { %1929 = vtanh.f32 %v1406_v36 }
0x3326   :  { %v1930_v15 = vpop.eup %1929 }
0x3327   :  { %v1408_v37 = vmul.f32 %v1930_v15, %v2167_v25  ;;  %v266_v15 = vadd.f32 %v2513_v58, %v2240_v10  ;;  %v1626_v58 = vld [vmem:[%s2703_s4 + $0x18] sm:$0xff] }
0x3328   :  { %1648 = vmatpush.msra.mxu1 %v1626_v58 }
0x3329   :  { %v1409_v38 = vadd.f32 %v1408_v37, %v2170_v30 }
0x332b   :  { %1412 = vrot.lane.b32.xlu1 %v1409_v38, %s2017_s24  ;;  %v1410_v41 = vmul.f32 %v1409_v38, %v1371_v28 }
0x339d   :  { %v1413_v39 = vpop.permute.xlu1 %1412 }
0x339e   :  { %v1415_v40 = vmul.f32 %v1413_v39, %v1409_v38 }
0x33a0   :  { %1417 = vrot.lane.b32.xlu2 %v1415_v40, %s2018_s8 }
0x33fa   :  { %v1418_v42 = vpop.permute.xlu2 %1417 }
0x33fb   :  { %v1420_v43 = vadd.f32 %v1418_v42, %v1410_v41 }
0x33fd   :  { %1931 = vtanh.f32 %v1420_v43 }
0x3403   :  { %v1932_v46 = vpop.eup %1931 }
0x3404   :  { %1423 = vrot.lane.b32.xlu0 %v1932_v46, %s2017_s24 }
0x3476   :  { %v1424_v44 = vpop.permute.xlu0 %1423 }
0x3477   :  { %v1426_v45 = vmul.f32 %v1424_v44, %v1409_v38 }
0x3479   :  { %1430 = vrot.lane.b32.xlu1 %v1426_v45, %s2018_s8 }
0x34eb   :  { %v1431_v49 = vpop.permute.xlu1 %1430 }
0x34ec   :  { %1818 = vmatmul.msk.f32.vlgmr.msra.gmra.mxu3 %vm303_vm4, %v1431_v49 }
0x356f   :  { %v1451_v51 = vpop.f32.mrf.mxu3 }
0x3570   :  { %v1454_v52 = vadd.f32 %v1451_v51, %v257_v50  ;;  %v1623_v50 = vld [vmem:[%s2703_s4] sm:$0xff] }
0x3572   :  { %v1455_v53 = vmul.f32 %v1454_v52, %v2167_v25 }
0x3574   :  { %1933 = vtanh.f32 %v1455_v53  ;;  %v1676_v53 = vld [vmem:[%s2705_s6 + $0x78] sm:$0xff] }
0x3575   :  { %1681 = vmatpush.msra.mxu2 %v1676_v53 }
0x357a   :  { %v1934_v54 = vpop.eup %1933 }
0x357b   :  { %v1457_v16 = vmul.f32 %v1934_v54, %v2167_v25  ;;  %v1675_v54 = vld [vmem:[%s2705_s6 + $0x70] sm:$0xff] }
0x357c   :  { %1682 = vmatpush.msra.mxu2 %v1675_v54 }
0x357d   :  { %v1458_v55 = vadd.f32 %v1457_v16, %v2170_v30  ;;  %v1674_v16 = vld [vmem:[%s2705_s6 + $0x68] sm:$0xff] }
0x357e   :  { %1683 = vmatpush.msra.mxu2 %v1674_v16 }
0x357f   :  { %1461 = vrot.lane.b32.xlu2 %v1458_v55, %s2017_s24  ;;  %v1459_v56 = vmul.f32 %v1458_v55, %v1420_v43 }
0x35d9   :  { %v1462_v13 = vpop.permute.xlu2 %1461 }
0x35da   :  { %v1464_v22 = vmul.f32 %v1462_v13, %v1458_v55  ;;  %v1672_v13 = vld [vmem:[%s2705_s6 + $0x58] sm:$0xff] }
0x35dc   :  { %1466 = vrot.lane.b32.xlu0 %v1464_v22, %s2018_s8  ;;  %v1671_v22 = vld [vmem:[%s2705_s6 + $0x50] sm:$0xff] }
0x364e   :  { %v1467_v57 = vpop.permute.xlu0 %1466 }
0x364f   :  { %v1469_v59 = vadd.f32 %v1467_v57, %v1459_v56  ;;  %v1670_v56 = vld [vmem:[%s2705_s6 + $0x48] sm:$0xff]  ;;  %v1669_v57 = vld [vmem:[%s2705_s6 + $0x40] sm:$0xff] }
0x3651   :  { %1935 = vtanh.f32 %v1469_v59 }
0x3657   :  { %v1936_v47 = vpop.eup %1935 }
0x3658   :  { %1472 = vrot.lane.b32.xlu1 %v1936_v47, %s2017_s24  ;;  %v1668_v47 = vld [vmem:[%s2705_s6 + $0x38] sm:$0xff] }
0x36ca   :  { %v1473_v60 = vpop.permute.xlu1 %1472 }
0x36cb   :  { %v1475_v61 = vmul.f32 %v1473_v60, %v1458_v55  ;;  %v1673_v55 = vld [vmem:[%s2705_s6 + $0x60] sm:$0xff]  ;;  %v1667_v60 = vld [vmem:[%s2705_s6 + $0x30] sm:$0xff] }
0x36cc   :  { %1684 = vmatpush.msra.mxu2 %v1673_v55 }
0x36cd   :  { %1479 = vrot.lane.b32.xlu2 %v1475_v61, %s2018_s8  ;;  %v1666_v61 = vld [vmem:[%s2705_s6 + $0x28] sm:$0xff] }
0x36ce   :  { %1685 = vmatpush.msra.mxu2 %v1672_v13 }
0x36d0   :  { %1686 = vmatpush.msra.mxu2 %v1671_v22 }
0x36d2   :  { %1687 = vmatpush.msra.mxu2 %v1670_v56 }
0x36d4   :  { %1688 = vmatpush.msra.mxu2 %v1669_v57 }
0x36d6   :  { %1689 = vmatpush.msra.mxu2 %v1668_v47 }
0x36d8   :  { %1690 = vmatpush.msra.mxu2 %v1667_v60 }
0x36da   :  { %1691 = vmatpush.msra.mxu2 %v1666_v61 }
0x3727   :  { %v1480_v62 = vpop.permute.xlu2 %1479 }
0x3728   :  { %1819 = vmatmul.msk.f32.vlgmr.msrb.gmra.mxu1 %vm303_vm4, %v1480_v62  ;;  %v1665_v62 = vld [vmem:[%s2705_s6 + $0x20] sm:$0xff] }
0x3729   :  { %1692 = vmatpush.msra.mxu2 %v1665_v62 }
0x37a5   :  { %v1500_v11 = vpop.f32.mrf.mxu1 }
0x37a6   :  { %v1503_v12 = vadd.f32 %v1500_v11, %v260_v2  ;;  %v1664_v2 = vld [vmem:[%s2705_s6 + $0x18] sm:$0xff]  ;;  %v1663_v11 = vld [vmem:[%s2705_s6 + $0x10] sm:$0xff] }
0x37a7   :  { %1693 = vmatpush.msra.mxu2 %v1664_v2 }
0x37a8   :  { %v1504_v18 = vmul.f32 %v1503_v12, %v2167_v25  ;;  %v1662_v12 = vld [vmem:[%s2705_s6 + $0x8] sm:$0xff] }
0x37a9   :  { %1694 = vmatpush.msra.mxu2 %v1663_v11 }
0x37aa   :  { %1937 = vtanh.f32 %v1504_v18  ;;  %v1661_v18 = vld [vmem:[%s2705_s6] sm:$0xff] }
0x37ab   :  { %1695 = vmatpush.msra.mxu2 %v1662_v12 }
0x37ad   :  { %1696 = vmatpush.msra.mxu2 %v1661_v18 }
0x37b0   :  { %v1938_v19 = vpop.eup %1937 }
0x37b1   :  { %v1506_v3 = vmul.f32 %v1938_v19, %v2167_v25  ;;  %v1721_v19 = vld [vmem:[#allocation3 + $0x78] sm:$0xff] }
0x37b2   :  { %1726 = vmatpush.msra.mxu3 %v1721_v19 }
0x37b3   :  { %v1507_v17 = vadd.f32 %v1506_v3, %v2170_v30  ;;  %v1720_v3 = vld [vmem:[#allocation3 + $0x70] sm:$0xff] }
0x37b4   :  { %1727 = vmatpush.msra.mxu3 %v1720_v3 }
0x37b5   :  { %1510 = vrot.lane.b32.xlu0 %v1507_v17, %s2017_s24  ;;  %v1508_v63 = vmul.f32 %v1507_v17, %v1469_v59 }
0x3827   :  { %v1511_v4 = vpop.permute.xlu0 %1510 }
0x3828   :  { %v1513_v5 = vmul.f32 %v1511_v4, %v1507_v17  ;;  %v1718_v4 = vld [vmem:[#allocation3 + $0x60] sm:$0xff] }
0x382a   :  { %1515 = vrot.lane.b32.xlu1 %v1513_v5, %s2018_s8  ;;  %v1717_v5 = vld [vmem:[#allocation3 + $0x58] sm:$0xff] }
0x389c   :  { %v1516_v0 = vpop.permute.xlu1 %1515 }
0x389d   :  { %v1518_v1 = vadd.f32 %v1516_v0, %v1508_v63  ;;  %v1716_v63 = vld [vmem:[#allocation3 + $0x50] sm:$0xff]  ;;  %v1715_v0 = vld [vmem:[#allocation3 + $0x48] sm:$0xff] }
0x389f   :  { %1939 = vtanh.f32 %v1518_v1 }
0x38a5   :  { %v1940_v48 = vpop.eup %1939 }
0x38a6   :  { %1521 = vrot.lane.b32.xlu2 %v1940_v48, %s2017_s24  ;;  %v1838_v48 = vld [vmem:[%s2704_s5] ss:$0 sm:$0xff] }
0x3900   :  { %v1522_v6 = vpop.permute.xlu2 %1521 }
0x3901   :  { %v1524_v14 = vmul.f32 %v1522_v6, %v1507_v17  ;;  %v1719_v17 = vld [vmem:[#allocation3 + $0x68] sm:$0xff] }
0x3902   :  { %1728 = vmatpush.msra.mxu3 %v1719_v17 }
0x3903   :  { %1528 = vrot.lane.b32.xlu0 %v1524_v14, %s2018_s8 }
0x3904   :  { %1729 = vmatpush.msra.mxu3 %v1718_v4 }
0x3906   :  { %1730 = vmatpush.msra.mxu3 %v1717_v5 }
0x3908   :  { %1731 = vmatpush.msra.mxu3 %v1716_v63 }
0x390a   :  { %1732 = vmatpush.msra.mxu3 %v1715_v0 }
0x3975   :  { %v1529_v7 = vpop.permute.xlu0 %1528 }
0x3976   :  { %1820 = vmatmul.msk.f32.vlgmr.msrb.gmra.mxu2 %vm303_vm4, %v1529_v7 }
0x39f9   :  { %v1549_v21 = vpop.f32.mrf.mxu2 }
0x39fa   :  { %v1552_v23 = vadd.f32 %v1549_v21, %v263_v8 }
0x39fc   :  { %v1553_v24 = vmul.f32 %v1552_v23, %v2167_v25 }
0x39fe   :  { %1941 = vtanh.f32 %v1553_v24  ;;  %v1713_v24 = vld [vmem:[#allocation3 + $0x38] sm:$0xff] }
0x3a04   :  { %v1942_v26 = vpop.eup %1941 }
0x3a05   :  { %v1555_v27 = vmul.f32 %v1942_v26, %v2167_v25  ;;  %v1712_v26 = vld [vmem:[#allocation3 + $0x30] sm:$0xff] }
0x3a07   :  { %v1556_v28 = vadd.f32 %v1555_v27, %v2170_v30  ;;  %v1711_v27 = vld [vmem:[#allocation3 + $0x28] sm:$0xff] }
0x3a09   :  { %1559 = vrot.lane.b32.xlu1 %v1556_v28, %s2017_s24  ;;  %v1557_v31 = vmul.f32 %v1556_v28, %v1518_v1  ;;  %v1714_v1 = vld [vmem:[#allocation3 + $0x40] sm:$0xff] }
0x3a0a   :  { %1733 = vmatpush.msra.mxu3 %v1714_v1 }
0x3a0c   :  { %1734 = vmatpush.msra.mxu3 %v1713_v24 }
0x3a0e   :  { %1735 = vmatpush.msra.mxu3 %v1712_v26 }
0x3a10   :  { %1736 = vmatpush.msra.mxu3 %v1711_v27 }
0x3a7b   :  { %v1560_v20 = vpop.permute.xlu1 %1559 }
0x3a7c   :  { %v1562_v29 = vmul.f32 %v1560_v20, %v1556_v28  ;;  %v1709_v20 = vld [vmem:[#allocation3 + $0x18] sm:$0xff] }
0x3a7e   :  { %1564 = vrot.lane.b32.xlu2 %v1562_v29, %s2018_s8  ;;  %v1708_v29 = vld [vmem:[#allocation3 + $0x10] sm:$0xff] }
0x3ad8   :  { %v1565_v32 = vpop.permute.xlu2 %1564 }
0x3ad9   :  { %v1567_v33 = vadd.f32 %v1565_v32, %v1557_v31  ;;  %v1707_v31 = vld [vmem:[#allocation3 + $0x8] sm:$0xff]  ;;  %v1706_v32 = vld [vmem:[#allocation3] sm:$0xff] }
0x3adb   :  { %1943 = vtanh.f32 %v1567_v33 }
0x3ae1   :  { %v1944_v9 = vpop.eup %1943 }
0x3ae2   :  { %1570 = vrot.lane.b32.xlu0 %v1944_v9, %s2017_s24 }
0x3b54   :  { %v1571_v34 = vpop.permute.xlu0 %1570 }
0x3b55   :  { %v1573_v35 = vmul.f32 %v1571_v34, %v1556_v28  ;;  %v1710_v28 = vld [vmem:[#allocation3 + $0x20] sm:$0xff] }
0x3b56   :  { %1737 = vmatpush.msra.mxu3 %v1710_v28 }
0x3b57   :  { %1577 = vrot.lane.b32.xlu1 %v1573_v35, %s2018_s8 }
0x3b58   :  { %1738 = vmatpush.msra.mxu3 %v1709_v20 }
0x3b5a   :  { %1739 = vmatpush.msra.mxu3 %v1708_v29 }
0x3b5c   :  { %1740 = vmatpush.msra.mxu3 %v1707_v31 }
0x3b5e   :  { %1741 = vmatpush.msra.mxu3 %v1706_v32 }
0x3bc9   :  { %v1578_v36 = vpop.permute.xlu1 %1577 }
0x3bca   :  { %1821 = vmatmul.msk.f32.vlgmr.msrb.gmra.mxu3 %vm303_vm4, %v1578_v36 }
0x3c4d   :  { %v1598_v37 = vpop.f32.mrf.mxu3 }
0x3c4e   :  { %v1601_v38 = vadd.f32 %v1598_v37, %v266_v15 }
0x3c50   :  { %v1602_v39 = vmul.f32 %v1601_v38, %v2167_v25  ;;  %v1840_v38 = vld [vmem:[%s2708_s9] ss:$0 sm:$0xff] }
0x3c52   :  { %1945 = vtanh.f32 %v1602_v39 }
0x3c58   :  { %v1946_v40 = vpop.eup %1945 }
0x3c59   :  { %v1604_v41 = vmul.f32 %v1946_v40, %v2167_v25  ;;  %v1625_v25 = vld [vmem:[%s2703_s4 + $0x10] sm:$0xff] }
0x3c5a   :  { %1649 = vmatpush.msra.mxu1 %v1625_v25 }
0x3c5b   :  { %v1605_v42 = vadd.f32 %v1604_v41, %v2170_v30  ;;  %v1624_v30 = vld [vmem:[%s2703_s4 + $0x8] sm:$0xff] }
0x3c5c   :  { %1650 = vmatpush.msra.mxu1 %v1624_v30 }
0x3c5d   :  { %1608 = vrot.lane.b32.xlu2 %v1605_v42, %s2017_s24  ;;  %v1606_v44 = vmul.f32 %v1605_v42, %v1567_v33  ;;  %v1839_v33 = vld [vmem:[%s2706_s7] ss:$0 sm:$0xff] }
0x3c5e   :  { %1651 = vmatpush.msra.mxu1 %v1623_v50 }
0x3cb7   :  { %v1609_v43 = vpop.permute.xlu2 %1608 }
0x3cb8   :  { %v1611_v46 = vmul.f32 %v1609_v43, %v1605_v42 }
0x3cba   :  { %1613 = vrot.lane.b32.xlu0 %v1611_v46, %s2018_s8 }
0x3d2c   :  { %v1614_v45 = vpop.permute.xlu0 %1613 }
0x3d2d   :  { %v1616_v49 = vadd.f32 %v1614_v45, %v1606_v44 }
0x3d2f   :  { %1947 = vtanh.f32 %v1616_v49 }
0x3d35   :  { %v1948_v10 = vpop.eup %1947 }
0x3d36   :  { %1619 = vrot.lane.b32.xlu1 %v1948_v10, %s2017_s24 }
0x3da8   :  { %v1620_v51 = vpop.permute.xlu1 %1619 }
0x3da9   :  { %v1622_v52 = vmul.f32 %v1620_v51, %v1605_v42 }
0x3dab   :  { %1632 = vrot.lane.b32.xlu2 %v1622_v52, %s2018_s8 }
0x3e05   :  { %v1633_v59 = vpop.permute.xlu2 %1632 }
0x3e06   :  { %1822 = vmatmul.msk.f32.vlgmr.msra.gmra.mxu1 %vm303_vm4, %v1633_v59 }
0x3e83   :  { %v1653_v6 = vpop.f32.mrf.mxu1 }
0x3e84   :  { %v1654_v14 = vadd.f32 %v1838_v48, %v1653_v6 }
0x3e86   :  { %v1657_v7 = vmul.f32 1.442695, %v1654_v14  ;;  %vm1656_vm5 = vcmp.gt.f32.partialorder %v1654_v14, 0.0 }
0x3e88   :  { %1949 = vpow2.f32 %v1657_v7 }
0x3e8e   :  { %v1950_v8 = vpop.eup %1949 }
0x3e8f   :  { %v1823_v21 = vadd.f32 -1.0, %v1950_v8 }
0x3e91   :  { %v1660_v23 = vsel %vm1656_vm5, %v1654_v14, %v1823_v21 }
0x3e92   :  { %1697 = vmatmul.f32.vlgmr.msra.gmra.mxu2 %v1660_v23 }
0x3f15   :  { %v1698_v9 = vpop.f32.mrf.mxu2 }
0x3f16   :  { %v1699_v34 = vadd.f32 %v1839_v33, %v1698_v9 }
0x3f18   :  { %v1702_v35 = vmul.f32 1.442695, %v1699_v34  ;;  %vm1701_vm6 = vcmp.gt.f32.partialorder %v1699_v34, 0.0 }
0x3f1a   :  { %1951 = vpow2.f32 %v1702_v35 }
0x3f20   :  { %v1952_v36 = vpop.eup %1951 }
0x3f21   :  { %v1824_v15 = vadd.f32 -1.0, %v1952_v36 }
0x3f23   :  { %v1705_v37 = vsel %vm1701_vm6, %v1699_v34, %v1824_v15 }
0x3f24   :  { %1742 = vmatmul.f32.vlgmr.msra.gmra.mxu3 %v1705_v37 }
0x3fa7   :  { %v1743_v39 = vpop.f32.mrf.mxu3 }
0x3fa8   :  { %v1744_v40 = vadd.f32 %v1840_v38, %v1743_v39 }
0x3faa   :  { %v1747_v41 = vmul.f32 1.442695, %v1744_v40  ;;  %vm1746_vm7 = vcmp.gt.f32.partialorder %v1744_v40, 0.0 }
0x3fac   :  { %1953 = vpow2.f32 %v1747_v41 }
0x3fb2   :  { %v1954_v42 = vpop.eup %1953 }
0x3fb3   :  { %v1825_v43 = vadd.f32 -1.0, %v1954_v42 }
0x3fb5   :  { %v1750_v46 = vsel %vm1746_vm7, %v1744_v40, %v1825_v43 }
0x3fb6   :  { %1751 = vst [vmem:[#allocation6] sm:$0xff] %v1750_v46 }
0x3fb7   :  { %1762 = dma.vmem_to_hbm [thread:$0]  %s1758_s27, 128, %s1760_s28, [#allocation5]  }
0x3fb8   :  { %2010 = dma.done.wait [#allocation5], 128  }
0x3fb9   :  { %2011 = vsyncadd [#allocation5], 4294967168 }
0x3fba   :  { %1767 = vsyncpa [#allocation4], 1 }
0x3fbb   :  { %1768 = vsyncpa [#allocation5], 1 }

</bundles_post_ra>
